<compile_context>
chip_gen: v5e
topology: v5e:2x2
jax: 0.10.0
libtpu: 0.0.40
codegen_flags: <defaults>
</compile_context>

<pallas_src>
import jax
import jax.numpy as jnp
from jax.experimental import pallas as pl
from jax.experimental.pallas import tpu as pltpu

LANE = 128  # lane-pad target for all channel-like dims


# ---------------------------------------------------------------------------
# Pallas kernels
# ---------------------------------------------------------------------------

def _conv_stage_kernel(p_ref, w_ref, shift_ref, o_ref):
    """Fused conv3x3 + folded-BN + ReLU + maxpool2x2 for one row tile.

    p_ref:     (4, tn, Kpad) bf16  im2col rows for the 4 positions of each 2x2
                                   pool window (same output-pixel tile).
    w_ref:     (Kpad, 128)   bf16  conv weights with the BN scale pre-folded.
    shift_ref: (1, 128)      f32   folded BN shift (+conv bias).
    o_ref:     (tn, 128)     bf16  maxpool2x2(relu(bn(conv(x)))).
    """
    tn = o_ref.shape[0]
    k = p_ref.shape[2]
    # Stack the four pool-slot operands into one long matmul (single MXU pass).
    p = p_ref[...].reshape(4 * tn, k)
    z = jnp.dot(p, w_ref[...], preferred_element_type=jnp.float32)      # (4*tn, 128)
    # Max over the 4 pool slots first; the additive shift commutes with max,
    # so the f32 epilogue only touches tn rows instead of 4*tn.
    m = jnp.maximum(jnp.maximum(z[0 * tn:1 * tn], z[1 * tn:2 * tn]),
                    jnp.maximum(z[2 * tn:3 * tn], z[3 * tn:4 * tn]))
    o_ref[...] = jnp.maximum(m + shift_ref[...], 0.0).astype(o_ref.dtype)


def _tail_kernel(p3_ref, w3_ref, shift3_ref, fw1_ref, fb1_ref, fw2_ref, fb2_ref,
                 fw3_ref, fb3_ref, o_ref):
    """stage3 (conv+BN+ReLU+pool) fused with the whole MLP.

    p3_ref:  (4, 16*Bp, K3pad) bf16, POSITION-major rows (row = p*Bp + b).
    fw1_ref: (16, 128, 128) bf16, fc1 weight regrouped per spatial position
             (rows = padded channels, cols = padded fc1 outputs).
    o_ref:   (Bp, 128) f32 logits (10 real columns).
    """
    n3 = p3_ref.shape[1]          # 16 * Bp
    k3 = p3_ref.shape[2]
    bsz, cfc = o_ref.shape        # Bp (multiple of 8), 128
    npos = n3 // bsz              # 16 pooled spatial positions (4 x 4)

    # ---- stage3: conv3x3 + BN(folded) + ReLU + maxpool2x2 ----
    p = p3_ref[...].reshape(4 * n3, k3)
    z = jnp.dot(p, w3_ref[...], preferred_element_type=jnp.float32)
    m = jnp.maximum(jnp.maximum(z[0 * n3:1 * n3], z[1 * n3:2 * n3]),
                    jnp.maximum(z[2 * n3:3 * n3], z[3 * n3:4 * n3]))
    act = jnp.maximum(m + shift3_ref[...], 0.0)                          # (16*Bp, 128) f32

    # ---- fc1 with torch.flatten fused: sum over spatial positions ----
    # act rows are position-major, so each per-position slice is Bp rows and
    # sublane-aligned (Bp is a multiple of 8).
    h = jnp.zeros((bsz, cfc), jnp.float32)
    for ppos in range(npos):
        a_p = act[ppos * bsz:(ppos + 1) * bsz, :].astype(jnp.bfloat16)   # (Bp, 128)
        h = h + jnp.dot(a_p, fw1_ref[ppos], preferred_element_type=jnp.float32)
    h = jnp.maximum(h + fb1_ref[...], 0.0).astype(jnp.bfloat16)
    # dropout1: identity at inference
    h = jnp.maximum(jnp.dot(h, fw2_ref[...], preferred_element_type=jnp.float32)
                    + fb2_ref[...], 0.0).astype(jnp.bfloat16)
    # dropout2: identity at inference
    o_ref[...] = (jnp.dot(h, fw3_ref[...], preferred_element_type=jnp.float32)
                  + fb3_ref[...]).astype(o_ref.dtype)


# ---------------------------------------------------------------------------
# Wrappers / glue (im2col, tiling, parameter folding) in plain JAX
# ---------------------------------------------------------------------------

def _pick_tile(n, target=1024):
    """Largest multiple of 16 that divides n, is <= target, and leaves at least
    2 grid steps (so v7x can shard tiles across its 2 TensorCores)."""
    if n % 16 != 0 or n < 32:
        return n
    cap = min(target, n // 2)
    cap -= cap % 16
    if cap < 16:
        return n
    t = cap
    while t >= 16:
        if n % t == 0:
            return t
        t -= 16
    return n


def _im2col_pool_stacked(x_nhwc, k_pad, pos_major=False):
    """(B,H,W,Cin) -> (4, N, k_pad) bf16: im2col rows grouped by 2x2 pool slot.

    Row order is batch-major (b, i, j) by default; position-major ((i, j), b)
    when pos_major=True (used by the fused tail so fc1 can sum over positions
    with aligned slices).  The activation is cast to bf16 BEFORE the build and
    K is only padded to k_pad (a multiple of 32), keeping the intermediate small.
    """
    B, H, W, C = x_nhwc.shape
    x = x_nhwc.astype(jnp.bfloat16)
    xp = jnp.pad(x, ((0, 0), (1, 1), (1, 1), (0, 0)))
    taps = [xp[:, dy:dy + H, dx:dx + W, :] for dy in range(3) for dx in range(3)]
    patches = jnp.concatenate(taps, axis=-1)                 # (B, H, W, 9*Cin) bf16
    K = 9 * C
    Ho, Wo = H // 2, W // 2
    N = B * Ho * Wo

    def slot(oy, ox):
        s = patches[:, oy::2, ox::2, :]                      # (B, Ho, Wo, K)
        if pos_major:
            s = jnp.transpose(s, (1, 2, 0, 3))               # (Ho, Wo, B, K)
        return s.reshape(N, K)

    slots = jnp.stack([slot(0, 0), slot(0, 1), slot(1, 0), slot(1, 1)], axis=0)
    if k_pad > K:
        slots = jnp.pad(slots, ((0, 0), (0, 0), (0, k_pad - K)))
    return slots, (B, Ho, Wo)


def conv_stage(x_nhwc, w_flat, shift):
    """One fused conv+bn+relu+pool stage.  Returns (B, H/2, W/2, 128) bf16 with
    channels >= Cout exactly zero."""
    k_pad, c_pad = w_flat.shape
    slots, (B, Ho, Wo) = _im2col_pool_stacked(x_nhwc, k_pad)
    N = B * Ho * Wo
    tn = _pick_tile(N)
    out = pl.pallas_call(
        _conv_stage_kernel,
        out_shape=jax.ShapeDtypeStruct((N, c_pad), jnp.bfloat16),
        grid=(N // tn,),
        in_specs=[
            pl.BlockSpec((4, tn, k_pad), lambda i: (0, i, 0)),
            pl.BlockSpec((k_pad, c_pad), lambda i: (0, 0)),
            pl.BlockSpec((1, c_pad), lambda i: (0, 0)),
        ],
        out_specs=pl.BlockSpec((tn, c_pad), lambda i: (i, 0)),
        compiler_params=pltpu.CompilerParams(
            dimension_semantics=("parallel",),
            vmem_limit_bytes=32 * 1024 * 1024,
        ),
    )(slots, w_flat, shift)
    return out.reshape(B, Ho, Wo, c_pad)


def tail_stage3_mlp(x_nhwc, w3c, shift3, fw1, fb1, fw2, fb2, fw3, fb3, out_dim):
    """Fused stage3 conv+bn+relu+pool + fc1/relu/fc2/relu/fc3 in one pallas_call."""
    B = x_nhwc.shape[0]
    bp = ((B + 7) // 8) * 8                      # pad batch so per-position slices
    if bp > B:                                   # inside the kernel are 8-row aligned
        x_nhwc = jnp.pad(x_nhwc, ((0, bp - B), (0, 0), (0, 0), (0, 0)))
    k3_pad = w3c.shape[0]
    p3, _ = _im2col_pool_stacked(x_nhwc, k3_pad, pos_major=True)   # (4, 16*bp, k3_pad)
    out = pl.pallas_call(
        _tail_kernel,
        out_shape=jax.ShapeDtypeStruct((bp, fw3.shape[1]), jnp.float32),
        in_specs=[pl.BlockSpec(memory_space=pltpu.MemorySpace.VMEM)] * 9,
        out_specs=pl.BlockSpec(memory_space=pltpu.MemorySpace.VMEM),
        compiler_params=pltpu.CompilerParams(vmem_limit_bytes=32 * 1024 * 1024),
    )(p3, w3c, shift3, fw1, fb1, fw2, fb2, fw3, fb3)
    return out[:B, :out_dim]


def fold_conv_bn(conv_w, conv_b, gamma, beta, mean, var, eps=1e-5):
    """conv_w: (Cout, Cin, 3, 3) PyTorch layout.  Finishes the BN fold:
    the per-channel scale is multiplied into the weight columns (in f32, before
    the bf16 cast); only the additive shift remains for the kernel epilogue.
    Returns (w_flat bf16 (Kpad,128), shift f32 (1,128), cout)."""
    cout, cin = conv_w.shape[0], conv_w.shape[1]
    k = 9 * cin
    k_pad = ((k + 31) // 32) * 32                            # pad K only to mult of 32
    scale = gamma / jnp.sqrt(var + eps)                      # (Cout,)
    shift = beta + (conv_b - mean) * scale                   # (Cout,)
    # im2col row ordering is (dy, dx, cin): (Cout,Cin,3,3) -> (3,3,Cin,Cout)
    w_flat = jnp.transpose(conv_w, (2, 3, 1, 0)).reshape(k, cout)
    w_flat = w_flat * scale[None, :]                         # fold scale, f32
    w_flat = jnp.pad(w_flat, ((0, k_pad - k), (0, LANE - cout)))
    shift_p = jnp.pad(shift, (0, LANE - cout)).reshape(1, LANE).astype(jnp.float32)
    return w_flat.astype(jnp.bfloat16), shift_p, cout


def net_forward(x_nchw, params):
    # NCHW -> NHWC, cast to bf16 before any im2col work (assumes eval-mode BN /
    # dropout and even spatial dims: 32 -> 16 -> 8 -> 4).
    x = jnp.transpose(x_nchw, (0, 2, 3, 1)).astype(jnp.bfloat16)
    for name in ("stage1", "stage2"):
        w, shift, cout = params[name]
        x = conv_stage(x, w, shift)[..., :cout]              # strip lane padding
    w3c, shift3, _ = params["stage3"]
    fw1, fb1, fw2, fb2, fw3, fb3, out_dim = params["mlp"]
    return tail_stage3_mlp(x, w3c, shift3, fw1, fb1, fw2, fb2, fw3, fb3, out_dim)


# ---------------------------------------------------------------------------
# Deterministic synthetic parameters (PyTorch layouts, then folded/padded)
# ---------------------------------------------------------------------------

def make_params(key):
    ks = iter(jax.random.split(key, 32))

    def conv_bn(cin, cout):
        w = jax.random.normal(next(ks), (cout, cin, 3, 3), jnp.float32) * 0.1
        b = jax.random.normal(next(ks), (cout,), jnp.float32) * 0.05
        gamma = 1.0 + 0.1 * jax.random.normal(next(ks), (cout,), jnp.float32)
        beta = 0.1 * jax.random.normal(next(ks), (cout,), jnp.float32)
        mean = 0.05 * jax.random.normal(next(ks), (cout,), jnp.float32)
        var = 1.0 + 0.1 * jnp.abs(jax.random.normal(next(ks), (cout,), jnp.float32))
        return fold_conv_bn(w, b, gamma, beta, mean, var)

    def linear(din, dout):
        w = jax.random.normal(next(ks), (din, dout), jnp.float32) / jnp.sqrt(float(din))
        b = 0.05 * jax.random.normal(next(ks), (dout,), jnp.float32)
        return w, b

    def pad_lin(w, b, din_pad, dout_pad):
        w_p = jnp.pad(w, ((0, din_pad - w.shape[0]), (0, dout_pad - w.shape[1])))
        b_p = jnp.pad(b, (0, dout_pad - b.shape[0])).reshape(1, dout_pad)
        return w_p.astype(jnp.bfloat16), b_p.astype(jnp.float32)

    params = {
        "stage1": conv_bn(3, 8),
        "stage2": conv_bn(8, 12),
        "stage3": conv_bn(12, 16),
    }

    # fc1 weight in PyTorch row order (c, h, w) for the 16*4*4 flatten; regroup it
    # into 16 per-spatial-position (channels, outputs) blocks so the fused tail
    # kernel computes torch.flatten + fc1 as a sum over positions (no relayout).
    w1, b1 = linear(16 * 4 * 4, 100)                                  # (256, 100)
    w1_blocks = jnp.transpose(w1.reshape(16, 4, 4, 100), (1, 2, 0, 3)).reshape(16, 16, 100)
    fw1 = jnp.pad(w1_blocks, ((0, 0), (0, LANE - 16), (0, LANE - 100))).astype(jnp.bfloat16)
    fb1 = jnp.pad(b1, (0, LANE - 100)).reshape(1, LANE).astype(jnp.float32)

    w2, b2 = linear(100, 64)
    w3, b3 = linear(64, 10)
    fw2, fb2 = pad_lin(w2, b2, LANE, LANE)
    fw3, fb3 = pad_lin(w3, b3, LANE, LANE)

    params["mlp"] = (fw1, fb1, fw2, fb2, fw3, fb3, 10)
    return params


if __name__ == "__main__":
    key = jax.random.PRNGKey(0)
    k_x, k_p = jax.random.split(key)
    # Spatial size must be 32x32 so that after 3 maxpools we hit 16*4*4 for fc1.
    x = jax.random.normal(k_x, (2, 3, 32, 32), jnp.float32)   # NCHW like PyTorch
    params = make_params(k_p)

    out = jax.jit(lambda xx: net_forward(xx, params))(x)
    jax.block_until_ready(out)
    assert out.shape == (2, 10) and out.dtype == jnp.float32
    print("KERNEL_OK")
</pallas_src>

<mosaic_0001>
module attributes {stable_mosaic.version = 11 : i64} {
  func.func @_conv_stage_kernel(%arg0: i32, %arg1: memref<4x256x32xbf16, #tpu.memory_space<vmem>>, %arg2: memref<32x128xbf16, #tpu.memory_space<vmem>>, %arg3: memref<1x128xf32, #tpu.memory_space<vmem>>, %arg4: memref<256x128xbf16, #tpu.memory_space<vmem>>) attributes {dimension_semantics = [#tpu.dimension_semantics<parallel>], iteration_bounds = array<i64: 2>, scalar_prefetch = 0 : i64, scratch_operands = 0 : i64, tpu.core_type = #tpu.core_type<tc>, window_params = [{transform_indices = @transform_0, window_bounds = array<i64: 4, 256, 32>}, {pipeline_mode = #tpu.pipeline_mode<synchronous>, transform_indices = @transform_1, window_bounds = array<i64: 32, 128>}, {pipeline_mode = #tpu.pipeline_mode<synchronous>, transform_indices = @transform_2, window_bounds = array<i64: 1, 128>}, {transform_indices = @transform_3, window_bounds = array<i64: 256, 128>}]} {
    %c0 = arith.constant 0 : index
    %c0_0 = arith.constant 0 : index
    %c0_1 = arith.constant 0 : index
    %0 = vector.load %arg1[%c0, %c0_0, %c0_1] : memref<4x256x32xbf16, #tpu.memory_space<vmem>>, vector<4x256x32xbf16>
    %1 = vector.shape_cast %0 : vector<4x256x32xbf16> to vector<1024x32xbf16>
    %c0_2 = arith.constant 0 : index
    %c0_3 = arith.constant 0 : index
    %2 = vector.load %arg2[%c0_2, %c0_3] : memref<32x128xbf16, #tpu.memory_space<vmem>>, vector<32x128xbf16>
    %cst = arith.constant dense<0.000000e+00> : vector<1024x128xf32>
    %3 = tpu.matmul %1, %2, %cst {dimension_numbers = #tpu.dot_dimension_numbers<[1], [0], [0], [1], [0, 0, 1, 1], [], []>} : vector<1024x32xbf16>, vector<32x128xbf16>, vector<1024x128xf32> -> vector<1024x128xf32>
    %4 = vector.extract_strided_slice %3 {offsets = [0, 0], sizes = [256, 128], strides = [1, 1]} : vector<1024x128xf32> to vector<256x128xf32>
    %5 = vector.extract_strided_slice %3 {offsets = [256, 0], sizes = [256, 128], strides = [1, 1]} : vector<1024x128xf32> to vector<256x128xf32>
    %6 = arith.maximumf %4, %5 : vector<256x128xf32>
    %7 = vector.extract_strided_slice %3 {offsets = [512, 0], sizes = [256, 128], strides = [1, 1]} : vector<1024x128xf32> to vector<256x128xf32>
    %8 = vector.extract_strided_slice %3 {offsets = [768, 0], sizes = [256, 128], strides = [1, 1]} : vector<1024x128xf32> to vector<256x128xf32>
    %9 = arith.maximumf %7, %8 : vector<256x128xf32>
    %10 = arith.maximumf %6, %9 : vector<256x128xf32>
    %c0_4 = arith.constant 0 : index
    %c0_5 = arith.constant 0 : index
    %11 = vector.load %arg3[%c0_4, %c0_5] : memref<1x128xf32, #tpu.memory_space<vmem>>, vector<1x128xf32>
    %12 = vector.broadcast %11 : vector<1x128xf32> to vector<256x128xf32>
    %13 = arith.addf %10, %12 : vector<256x128xf32>
    %cst_6 = arith.constant 0.000000e+00 : f32
    %14 = vector.broadcast %cst_6 : f32 to vector<256x128xf32>
    %15 = arith.maximumf %13, %14 : vector<256x128xf32>
    %16 = arith.truncf %15 : vector<256x128xf32> to vector<256x128xbf16>
    %c0_7 = arith.constant 0 : index
    %c0_8 = arith.constant 0 : index
    %17 = vector.load %arg4[%c0_7, %c0_8] : memref<256x128xbf16, #tpu.memory_space<vmem>>, vector<256x128xbf16>
    tpu.vector_store %arg4[%c0_7, %c0_8], %16 {strides = array<i32>} : memref<256x128xbf16, #tpu.memory_space<vmem>>, vector<256x128xbf16>,
    return
  }
  func.func @transform_0(%arg0: i32) -> (i32, i32, i32) {
    %c0_i32 = arith.constant 0 : i32
    %c0_i32_0 = arith.constant 0 : i32
    %c0_i32_1 = arith.constant 0 : i32
    return %c0_i32, %arg0, %c0_i32_0 : i32, i32, i32
  }
  func.func @transform_1(%arg0: i32) -> (i32, i32) {
    %c0_i32 = arith.constant 0 : i32
    %c0_i32_0 = arith.constant 0 : i32
    %c0_i32_1 = arith.constant 0 : i32
    return %c0_i32, %c0_i32_0 : i32, i32
  }
  func.func @transform_2(%arg0: i32) -> (i32, i32) {
    %c0_i32 = arith.constant 0 : i32
    %c0_i32_0 = arith.constant 0 : i32
    %c0_i32_1 = arith.constant 0 : i32
    return %c0_i32, %c0_i32_0 : i32, i32
  }
  func.func @transform_3(%arg0: i32) -> (i32, i32) {
    %c0_i32 = arith.constant 0 : i32
    %c0_i32_0 = arith.constant 0 : i32
    return %arg0, %c0_i32 : i32, i32
  }
}

module attributes {stable_mosaic.version = 11 : i64} {
  func.func @_conv_stage_kernel(%arg0: i32, %arg1: memref<4x64x96xbf16, #tpu.memory_space<vmem>>, %arg2: memref<96x128xbf16, #tpu.memory_space<vmem>>, %arg3: memref<1x128xf32, #tpu.memory_space<vmem>>, %arg4: memref<64x128xbf16, #tpu.memory_space<vmem>>) attributes {dimension_semantics = [#tpu.dimension_semantics<parallel>], iteration_bounds = array<i64: 2>, scalar_prefetch = 0 : i64, scratch_operands = 0 : i64, tpu.core_type = #tpu.core_type<tc>, window_params = [{transform_indices = @transform_0, window_bounds = array<i64: 4, 64, 96>}, {pipeline_mode = #tpu.pipeline_mode<synchronous>, transform_indices = @transform_1, window_bounds = array<i64: 96, 128>}, {pipeline_mode = #tpu.pipeline_mode<synchronous>, transform_indices = @transform_2, window_bounds = array<i64: 1, 128>}, {transform_indices = @transform_3, window_bounds = array<i64: 64, 128>}]} {
    %c0 = arith.constant 0 : index
    %c0_0 = arith.constant 0 : index
    %c0_1 = arith.constant 0 : index
    %0 = vector.load %arg1[%c0, %c0_0, %c0_1] : memref<4x64x96xbf16, #tpu.memory_space<vmem>>, vector<4x64x96xbf16>
    %1 = vector.shape_cast %0 : vector<4x64x96xbf16> to vector<256x96xbf16>
    %c0_2 = arith.constant 0 : index
    %c0_3 = arith.constant 0 : index
    %2 = vector.load %arg2[%c0_2, %c0_3] : memref<96x128xbf16, #tpu.memory_space<vmem>>, vector<96x128xbf16>
    %cst = arith.constant dense<0.000000e+00> : vector<256x128xf32>
    %3 = tpu.matmul %1, %2, %cst {dimension_numbers = #tpu.dot_dimension_numbers<[1], [0], [0], [1], [0, 0, 1, 1], [], []>} : vector<256x96xbf16>, vector<96x128xbf16>, vector<256x128xf32> -> vector<256x128xf32>
    %4 = vector.extract_strided_slice %3 {offsets = [0, 0], sizes = [64, 128], strides = [1, 1]} : vector<256x128xf32> to vector<64x128xf32>
    %5 = vector.extract_strided_slice %3 {offsets = [64, 0], sizes = [64, 128], strides = [1, 1]} : vector<256x128xf32> to vector<64x128xf32>
    %6 = arith.maximumf %4, %5 : vector<64x128xf32>
    %7 = vector.extract_strided_slice %3 {offsets = [128, 0], sizes = [64, 128], strides = [1, 1]} : vector<256x128xf32> to vector<64x128xf32>
    %8 = vector.extract_strided_slice %3 {offsets = [192, 0], sizes = [64, 128], strides = [1, 1]} : vector<256x128xf32> to vector<64x128xf32>
    %9 = arith.maximumf %7, %8 : vector<64x128xf32>
    %10 = arith.maximumf %6, %9 : vector<64x128xf32>
    %c0_4 = arith.constant 0 : index
    %c0_5 = arith.constant 0 : index
    %11 = vector.load %arg3[%c0_4, %c0_5] : memref<1x128xf32, #tpu.memory_space<vmem>>, vector<1x128xf32>
    %12 = vector.broadcast %11 : vector<1x128xf32> to vector<64x128xf32>
    %13 = arith.addf %10, %12 : vector<64x128xf32>
    %cst_6 = arith.constant 0.000000e+00 : f32
    %14 = vector.broadcast %cst_6 : f32 to vector<64x128xf32>
    %15 = arith.maximumf %13, %14 : vector<64x128xf32>
    %16 = arith.truncf %15 : vector<64x128xf32> to vector<64x128xbf16>
    %c0_7 = arith.constant 0 : index
    %c0_8 = arith.constant 0 : index
    %17 = vector.load %arg4[%c0_7, %c0_8] : memref<64x128xbf16, #tpu.memory_space<vmem>>, vector<64x128xbf16>
    tpu.vector_store %arg4[%c0_7, %c0_8], %16 {strides = array<i32>} : memref<64x128xbf16, #tpu.memory_space<vmem>>, vector<64x128xbf16>,
    return
  }
  func.func @transform_0(%arg0: i32) -> (i32, i32, i32) {
    %c0_i32 = arith.constant 0 : i32
    %c0_i32_0 = arith.constant 0 : i32
    %c0_i32_1 = arith.constant 0 : i32
    return %c0_i32, %arg0, %c0_i32_0 : i32, i32, i32
  }
  func.func @transform_1(%arg0: i32) -> (i32, i32) {
    %c0_i32 = arith.constant 0 : i32
    %c0_i32_0 = arith.constant 0 : i32
    %c0_i32_1 = arith.constant 0 : i32
    return %c0_i32, %c0_i32_0 : i32, i32
  }
  func.func @transform_2(%arg0: i32) -> (i32, i32) {
    %c0_i32 = arith.constant 0 : i32
    %c0_i32_0 = arith.constant 0 : i32
    %c0_i32_1 = arith.constant 0 : i32
    return %c0_i32, %c0_i32_0 : i32, i32
  }
  func.func @transform_3(%arg0: i32) -> (i32, i32) {
    %c0_i32 = arith.constant 0 : i32
    %c0_i32_0 = arith.constant 0 : i32
    return %arg0, %c0_i32 : i32, i32
  }
}

module attributes {stable_mosaic.version = 11 : i64} {
  func.func @_tail_kernel(%arg0: memref<4x128x128xbf16, #tpu.memory_space<vmem>>, %arg1: memref<128x128xbf16, #tpu.memory_space<vmem>>, %arg2: memref<1x128xf32, #tpu.memory_space<vmem>>, %arg3: memref<16x128x128xbf16, #tpu.memory_space<vmem>>, %arg4: memref<1x128xf32, #tpu.memory_space<vmem>>, %arg5: memref<128x128xbf16, #tpu.memory_space<vmem>>, %arg6: memref<1x128xf32, #tpu.memory_space<vmem>>, %arg7: memref<128x128xbf16, #tpu.memory_space<vmem>>, %arg8: memref<1x128xf32, #tpu.memory_space<vmem>>, %arg9: memref<8x128xf32, #tpu.memory_space<vmem>>) attributes {dimension_semantics = [], scalar_prefetch = 0 : i64, scratch_operands = 0 : i64, tpu.core_type = #tpu.core_type<tc>} {
    %c0 = arith.constant 0 : index
    %c0_0 = arith.constant 0 : index
    %c0_1 = arith.constant 0 : index
    %0 = vector.load %arg0[%c0, %c0_0, %c0_1] : memref<4x128x128xbf16, #tpu.memory_space<vmem>>, vector<4x128x128xbf16>
    %1 = vector.shape_cast %0 : vector<4x128x128xbf16> to vector<512x128xbf16>
    %c0_2 = arith.constant 0 : index
    %c0_3 = arith.constant 0 : index
    %2 = vector.load %arg1[%c0_2, %c0_3] : memref<128x128xbf16, #tpu.memory_space<vmem>>, vector<128x128xbf16>
    %cst = arith.constant dense<0.000000e+00> : vector<512x128xf32>
    %3 = tpu.matmul %1, %2, %cst {dimension_numbers = #tpu.dot_dimension_numbers<[1], [0], [0], [1], [0, 0, 1, 1], [], []>} : vector<512x128xbf16>, vector<128x128xbf16>, vector<512x128xf32> -> vector<512x128xf32>
    %4 = vector.extract_strided_slice %3 {offsets = [0, 0], sizes = [128, 128], strides = [1, 1]} : vector<512x128xf32> to vector<128x128xf32>
    %5 = vector.extract_strided_slice %3 {offsets = [128, 0], sizes = [128, 128], strides = [1, 1]} : vector<512x128xf32> to vector<128x128xf32>
    %6 = arith.maximumf %4, %5 : vector<128x128xf32>
    %7 = vector.extract_strided_slice %3 {offsets = [256, 0], sizes = [128, 128], strides = [1, 1]} : vector<512x128xf32> to vector<128x128xf32>
    %8 = vector.extract_strided_slice %3 {offsets = [384, 0], sizes = [128, 128], strides = [1, 1]} : vector<512x128xf32> to vector<128x128xf32>
    %9 = arith.maximumf %7, %8 : vector<128x128xf32>
    %10 = arith.maximumf %6, %9 : vector<128x128xf32>
    %c0_4 = arith.constant 0 : index
    %c0_5 = arith.constant 0 : index
    %11 = vector.load %arg2[%c0_4, %c0_5] : memref<1x128xf32, #tpu.memory_space<vmem>>, vector<1x128xf32>
    %12 = vector.broadcast %11 : vector<1x128xf32> to vector<128x128xf32>
    %13 = arith.addf %10, %12 : vector<128x128xf32>
    %cst_6 = arith.constant 0.000000e+00 : f32
    %14 = vector.broadcast %cst_6 : f32 to vector<128x128xf32>
    %15 = arith.maximumf %13, %14 : vector<128x128xf32>
    %cst_7 = arith.constant 0.000000e+00 : f32
    %16 = vector.broadcast %cst_7 : f32 to vector<8x128xf32>
    %17 = vector.extract_strided_slice %15 {offsets = [0, 0], sizes = [8, 128], strides = [1, 1]} : vector<128x128xf32> to vector<8x128xf32>
    %18 = arith.truncf %17 : vector<8x128xf32> to vector<8x128xbf16>
    %c0_8 = arith.constant 0 : index
    %c0_9 = arith.constant 0 : index
    %c0_10 = arith.constant 0 : index
    %19 = vector.load %arg3[%c0_8, %c0_9, %c0_10] : memref<16x128x128xbf16, #tpu.memory_space<vmem>>, vector<1x128x128xbf16>
    %20 = vector.shape_cast %19 : vector<1x128x128xbf16> to vector<128x128xbf16>
    %cst_11 = arith.constant dense<0.000000e+00> : vector<8x128xf32>
    %21 = tpu.matmul %18, %20, %cst_11 {dimension_numbers = #tpu.dot_dimension_numbers<[1], [0], [0], [1], [0, 0, 1, 1], [], []>} : vector<8x128xbf16>, vector<128x128xbf16>, vector<8x128xf32> -> vector<8x128xf32>
    %22 = arith.addf %16, %21 : vector<8x128xf32>
    %23 = vector.extract_strided_slice %15 {offsets = [8, 0], sizes = [8, 128], strides = [1, 1]} : vector<128x128xf32> to vector<8x128xf32>
    %24 = arith.truncf %23 : vector<8x128xf32> to vector<8x128xbf16>
    %c1 = arith.constant 1 : index
    %c0_12 = arith.constant 0 : index
    %c0_13 = arith.constant 0 : index
    %25 = vector.load %arg3[%c1, %c0_12, %c0_13] : memref<16x128x128xbf16, #tpu.memory_space<vmem>>, vector<1x128x128xbf16>
    %26 = vector.shape_cast %25 : vector<1x128x128xbf16> to vector<128x128xbf16>
    %cst_14 = arith.constant dense<0.000000e+00> : vector<8x128xf32>
    %27 = tpu.matmul %24, %26, %cst_14 {dimension_numbers = #tpu.dot_dimension_numbers<[1], [0], [0], [1], [0, 0, 1, 1], [], []>} : vector<8x128xbf16>, vector<128x128xbf16>, vector<8x128xf32> -> vector<8x128xf32>
    %28 = arith.addf %22, %27 : vector<8x128xf32>
    %29 = vector.extract_strided_slice %15 {offsets = [16, 0], sizes = [8, 128], strides = [1, 1]} : vector<128x128xf32> to vector<8x128xf32>
    %30 = arith.truncf %29 : vector<8x128xf32> to vector<8x128xbf16>
    %c2 = arith.constant 2 : index
    %c0_15 = arith.constant 0 : index
    %c0_16 = arith.constant 0 : index
    %31 = vector.load %arg3[%c2, %c0_15, %c0_16] : memref<16x128x128xbf16, #tpu.memory_space<vmem>>, vector<1x128x128xbf16>
    %32 = vector.shape_cast %31 : vector<1x128x128xbf16> to vector<128x128xbf16>
    %cst_17 = arith.constant dense<0.000000e+00> : vector<8x128xf32>
    %33 = tpu.matmul %30, %32, %cst_17 {dimension_numbers = #tpu.dot_dimension_numbers<[1], [0], [0], [1], [0, 0, 1, 1], [], []>} : vector<8x128xbf16>, vector<128x128xbf16>, vector<8x128xf32> -> vector<8x128xf32>
    %34 = arith.addf %28, %33 : vector<8x128xf32>
    %35 = vector.extract_strided_slice %15 {offsets = [24, 0], sizes = [8, 128], strides = [1, 1]} : vector<128x128xf32> to vector<8x128xf32>
    %36 = arith.truncf %35 : vector<8x128xf32> to vector<8x128xbf16>
    %c3 = arith.constant 3 : index
    %c0_18 = arith.constant 0 : index
    %c0_19 = arith.constant 0 : index
    %37 = vector.load %arg3[%c3, %c0_18, %c0_19] : memref<16x128x128xbf16, #tpu.memory_space<vmem>>, vector<1x128x128xbf16>
    %38 = vector.shape_cast %37 : vector<1x128x128xbf16> to vector<128x128xbf16>
    %cst_20 = arith.constant dense<0.000000e+00> : vector<8x128xf32>
    %39 = tpu.matmul %36, %38, %cst_20 {dimension_numbers = #tpu.dot_dimension_numbers<[1], [0], [0], [1], [0, 0, 1, 1], [], []>} : vector<8x128xbf16>, vector<128x128xbf16>, vector<8x128xf32> -> vector<8x128xf32>
    %40 = arith.addf %34, %39 : vector<8x128xf32>
    %41 = vector.extract_strided_slice %15 {offsets = [32, 0], sizes = [8, 128], strides = [1, 1]} : vector<128x128xf32> to vector<8x128xf32>
    %42 = arith.truncf %41 : vector<8x128xf32> to vector<8x128xbf16>
    %c4 = arith.constant 4 : index
    %c0_21 = arith.constant 0 : index
    %c0_22 = arith.constant 0 : index
    %43 = vector.load %arg3[%c4, %c0_21, %c0_22] : memref<16x128x128xbf16, #tpu.memory_space<vmem>>, vector<1x128x128xbf16>
    %44 = vector.shape_cast %43 : vector<1x128x128xbf16> to vector<128x128xbf16>
    %cst_23 = arith.constant dense<0.000000e+00> : vector<8x128xf32>
    %45 = tpu.matmul %42, %44, %cst_23 {dimension_numbers = #tpu.dot_dimension_numbers<[1], [0], [0], [1], [0, 0, 1, 1], [], []>} : vector<8x128xbf16>, vector<128x128xbf16>, vector<8x128xf32> -> vector<8x128xf32>
    %46 = arith.addf %40, %45 : vector<8x128xf32>
    %47 = vector.extract_strided_slice %15 {offsets = [40, 0], sizes = [8, 128], strides = [1, 1]} : vector<128x128xf32> to vector<8x128xf32>
    %48 = arith.truncf %47 : vector<8x128xf32> to vector<8x128xbf16>
    %c5 = arith.constant 5 : index
    %c0_24 = arith.constant 0 : index
    %c0_25 = arith.constant 0 : index
    %49 = vector.load %arg3[%c5, %c0_24, %c0_25] : memref<16x128x128xbf16, #tpu.memory_space<vmem>>, vector<1x128x128xbf16>
    %50 = vector.shape_cast %49 : vector<1x128x128xbf16> to vector<128x128xbf16>
    %cst_26 = arith.constant dense<0.000000e+00> : vector<8x128xf32>
    %51 = tpu.matmul %48, %50, %cst_26 {dimension_numbers = #tpu.dot_dimension_numbers<[1], [0], [0], [1], [0, 0, 1, 1], [], []>} : vector<8x128xbf16>, vector<128x128xbf16>, vector<8x128xf32> -> vector<8x128xf32>
    %52 = arith.addf %46, %51 : vector<8x128xf32>
    %53 = vector.extract_strided_slice %15 {offsets = [48, 0], sizes = [8, 128], strides = [1, 1]} : vector<128x128xf32> to vector<8x128xf32>
    %54 = arith.truncf %53 : vector<8x128xf32> to vector<8x128xbf16>
    %c6 = arith.constant 6 : index
    %c0_27 = arith.constant 0 : index
    %c0_28 = arith.constant 0 : index
    %55 = vector.load %arg3[%c6, %c0_27, %c0_28] : memref<16x128x128xbf16, #tpu.memory_space<vmem>>, vector<1x128x128xbf16>
    %56 = vector.shape_cast %55 : vector<1x128x128xbf16> to vector<128x128xbf16>
    %cst_29 = arith.constant dense<0.000000e+00> : vector<8x128xf32>
    %57 = tpu.matmul %54, %56, %cst_29 {dimension_numbers = #tpu.dot_dimension_numbers<[1], [0], [0], [1], [0, 0, 1, 1], [], []>} : vector<8x128xbf16>, vector<128x128xbf16>, vector<8x128xf32> -> vector<8x128xf32>
    %58 = arith.addf %52, %57 : vector<8x128xf32>
    %59 = vector.extract_strided_slice %15 {offsets = [56, 0], sizes = [8, 128], strides = [1, 1]} : vector<128x128xf32> to vector<8x128xf32>
    %60 = arith.truncf %59 : vector<8x128xf32> to vector<8x128xbf16>
    %c7 = arith.constant 7 : index
    %c0_30 = arith.constant 0 : index
    %c0_31 = arith.constant 0 : index
    %61 = vector.load %arg3[%c7, %c0_30, %c0_31] : memref<16x128x128xbf16, #tpu.memory_space<vmem>>, vector<1x128x128xbf16>
    %62 = vector.shape_cast %61 : vector<1x128x128xbf16> to vector<128x128xbf16>
    %cst_32 = arith.constant dense<0.000000e+00> : vector<8x128xf32>
    %63 = tpu.matmul %60, %62, %cst_32 {dimension_numbers = #tpu.dot_dimension_numbers<[1], [0], [0], [1], [0, 0, 1, 1], [], []>} : vector<8x128xbf16>, vector<128x128xbf16>, vector<8x128xf32> -> vector<8x128xf32>
    %64 = arith.addf %58, %63 : vector<8x128xf32>
    %65 = vector.extract_strided_slice %15 {offsets = [64, 0], sizes = [8, 128], strides = [1, 1]} : vector<128x128xf32> to vector<8x128xf32>
    %66 = arith.truncf %65 : vector<8x128xf32> to vector<8x128xbf16>
    %c8 = arith.constant 8 : index
    %c0_33 = arith.constant 0 : index
    %c0_34 = arith.constant 0 : index
    %67 = vector.load %arg3[%c8, %c0_33, %c0_34] : memref<16x128x128xbf16, #tpu.memory_space<vmem>>, vector<1x128x128xbf16>
    %68 = vector.shape_cast %67 : vector<1x128x128xbf16> to vector<128x128xbf16>
    %cst_35 = arith.constant dense<0.000000e+00> : vector<8x128xf32>
    %69 = tpu.matmul %66, %68, %cst_35 {dimension_numbers = #tpu.dot_dimension_numbers<[1], [0], [0], [1], [0, 0, 1, 1], [], []>} : vector<8x128xbf16>, vector<128x128xbf16>, vector<8x128xf32> -> vector<8x128xf32>
    %70 = arith.addf %64, %69 : vector<8x128xf32>
    %71 = vector.extract_strided_slice %15 {offsets = [72, 0], sizes = [8, 128], strides = [1, 1]} : vector<128x128xf32> to vector<8x128xf32>
    %72 = arith.truncf %71 : vector<8x128xf32> to vector<8x128xbf16>
    %c9 = arith.constant 9 : index
    %c0_36 = arith.constant 0 : index
    %c0_37 = arith.constant 0 : index
    %73 = vector.load %arg3[%c9, %c0_36, %c0_37] : memref<16x128x128xbf16, #tpu.memory_space<vmem>>, vector<1x128x128xbf16>
    %74 = vector.shape_cast %73 : vector<1x128x128xbf16> to vector<128x128xbf16>
    %cst_38 = arith.constant dense<0.000000e+00> : vector<8x128xf32>
    %75 = tpu.matmul %72, %74, %cst_38 {dimension_numbers = #tpu.dot_dimension_numbers<[1], [0], [0], [1], [0, 0, 1, 1], [], []>} : vector<8x128xbf16>, vector<128x128xbf16>, vector<8x128xf32> -> vector<8x128xf32>
    %76 = arith.addf %70, %75 : vector<8x128xf32>
    %77 = vector.extract_strided_slice %15 {offsets = [80, 0], sizes = [8, 128], strides = [1, 1]} : vector<128x128xf32> to vector<8x128xf32>
    %78 = arith.truncf %77 : vector<8x128xf32> to vector<8x128xbf16>
    %c10 = arith.constant 10 : index
    %c0_39 = arith.constant 0 : index
    %c0_40 = arith.constant 0 : index
    %79 = vector.load %arg3[%c10, %c0_39, %c0_40] : memref<16x128x128xbf16, #tpu.memory_space<vmem>>, vector<1x128x128xbf16>
    %80 = vector.shape_cast %79 : vector<1x128x128xbf16> to vector<128x128xbf16>
    %cst_41 = arith.constant dense<0.000000e+00> : vector<8x128xf32>
    %81 = tpu.matmul %78, %80, %cst_41 {dimension_numbers = #tpu.dot_dimension_numbers<[1], [0], [0], [1], [0, 0, 1, 1], [], []>} : vector<8x128xbf16>, vector<128x128xbf16>, vector<8x128xf32> -> vector<8x128xf32>
    %82 = arith.addf %76, %81 : vector<8x128xf32>
    %83 = vector.extract_strided_slice %15 {offsets = [88, 0], sizes = [8, 128], strides = [1, 1]} : vector<128x128xf32> to vector<8x128xf32>
    %84 = arith.truncf %83 : vector<8x128xf32> to vector<8x128xbf16>
    %c11 = arith.constant 11 : index
    %c0_42 = arith.constant 0 : index
    %c0_43 = arith.constant 0 : index
    %85 = vector.load %arg3[%c11, %c0_42, %c0_43] : memref<16x128x128xbf16, #tpu.memory_space<vmem>>, vector<1x128x128xbf16>
    %86 = vector.shape_cast %85 : vector<1x128x128xbf16> to vector<128x128xbf16>
    %cst_44 = arith.constant dense<0.000000e+00> : vector<8x128xf32>
    %87 = tpu.matmul %84, %86, %cst_44 {dimension_numbers = #tpu.dot_dimension_numbers<[1], [0], [0], [1], [0, 0, 1, 1], [], []>} : vector<8x128xbf16>, vector<128x128xbf16>, vector<8x128xf32> -> vector<8x128xf32>
    %88 = arith.addf %82, %87 : vector<8x128xf32>
    %89 = vector.extract_strided_slice %15 {offsets = [96, 0], sizes = [8, 128], strides = [1, 1]} : vector<128x128xf32> to vector<8x128xf32>
    %90 = arith.truncf %89 : vector<8x128xf32> to vector<8x128xbf16>
    %c12 = arith.constant 12 : index
    %c0_45 = arith.constant 0 : index
    %c0_46 = arith.constant 0 : index
    %91 = vector.load %arg3[%c12, %c0_45, %c0_46] : memref<16x128x128xbf16, #tpu.memory_space<vmem>>, vector<1x128x128xbf16>
    %92 = vector.shape_cast %91 : vector<1x128x128xbf16> to vector<128x128xbf16>
    %cst_47 = arith.constant dense<0.000000e+00> : vector<8x128xf32>
    %93 = tpu.matmul %90, %92, %cst_47 {dimension_numbers = #tpu.dot_dimension_numbers<[1], [0], [0], [1], [0, 0, 1, 1], [], []>} : vector<8x128xbf16>, vector<128x128xbf16>, vector<8x128xf32> -> vector<8x128xf32>
    %94 = arith.addf %88, %93 : vector<8x128xf32>
    %95 = vector.extract_strided_slice %15 {offsets = [104, 0], sizes = [8, 128], strides = [1, 1]} : vector<128x128xf32> to vector<8x128xf32>
    %96 = arith.truncf %95 : vector<8x128xf32> to vector<8x128xbf16>
    %c13 = arith.constant 13 : index
    %c0_48 = arith.constant 0 : index
    %c0_49 = arith.constant 0 : index
    %97 = vector.load %arg3[%c13, %c0_48, %c0_49] : memref<16x128x128xbf16, #tpu.memory_space<vmem>>, vector<1x128x128xbf16>
    %98 = vector.shape_cast %97 : vector<1x128x128xbf16> to vector<128x128xbf16>
    %cst_50 = arith.constant dense<0.000000e+00> : vector<8x128xf32>
    %99 = tpu.matmul %96, %98, %cst_50 {dimension_numbers = #tpu.dot_dimension_numbers<[1], [0], [0], [1], [0, 0, 1, 1], [], []>} : vector<8x128xbf16>, vector<128x128xbf16>, vector<8x128xf32> -> vector<8x128xf32>
    %100 = arith.addf %94, %99 : vector<8x128xf32>
    %101 = vector.extract_strided_slice %15 {offsets = [112, 0], sizes = [8, 128], strides = [1, 1]} : vector<128x128xf32> to vector<8x128xf32>
    %102 = arith.truncf %101 : vector<8x128xf32> to vector<8x128xbf16>
    %c14 = arith.constant 14 : index
    %c0_51 = arith.constant 0 : index
    %c0_52 = arith.constant 0 : index
    %103 = vector.load %arg3[%c14, %c0_51, %c0_52] : memref<16x128x128xbf16, #tpu.memory_space<vmem>>, vector<1x128x128xbf16>
    %104 = vector.shape_cast %103 : vector<1x128x128xbf16> to vector<128x128xbf16>
    %cst_53 = arith.constant dense<0.000000e+00> : vector<8x128xf32>
    %105 = tpu.matmul %102, %104, %cst_53 {dimension_numbers = #tpu.dot_dimension_numbers<[1], [0], [0], [1], [0, 0, 1, 1], [], []>} : vector<8x128xbf16>, vector<128x128xbf16>, vector<8x128xf32> -> vector<8x128xf32>
    %106 = arith.addf %100, %105 : vector<8x128xf32>
    %107 = vector.extract_strided_slice %15 {offsets = [120, 0], sizes = [8, 128], strides = [1, 1]} : vector<128x128xf32> to vector<8x128xf32>
    %108 = arith.truncf %107 : vector<8x128xf32> to vector<8x128xbf16>
    %c15 = arith.constant 15 : index
    %c0_54 = arith.constant 0 : index
    %c0_55 = arith.constant 0 : index
    %109 = vector.load %arg3[%c15, %c0_54, %c0_55] : memref<16x128x128xbf16, #tpu.memory_space<vmem>>, vector<1x128x128xbf16>
    %110 = vector.shape_cast %109 : vector<1x128x128xbf16> to vector<128x128xbf16>
    %cst_56 = arith.constant dense<0.000000e+00> : vector<8x128xf32>
    %111 = tpu.matmul %108, %110, %cst_56 {dimension_numbers = #tpu.dot_dimension_numbers<[1], [0], [0], [1], [0, 0, 1, 1], [], []>} : vector<8x128xbf16>, vector<128x128xbf16>, vector<8x128xf32> -> vector<8x128xf32>
    %112 = arith.addf %106, %111 : vector<8x128xf32>
    %c0_57 = arith.constant 0 : index
    %c0_58 = arith.constant 0 : index
    %113 = vector.load %arg4[%c0_57, %c0_58] : memref<1x128xf32, #tpu.memory_space<vmem>>, vector<1x128xf32>
    %114 = vector.broadcast %113 : vector<1x128xf32> to vector<8x128xf32>
    %115 = arith.addf %112, %114 : vector<8x128xf32>
    %cst_59 = arith.constant 0.000000e+00 : f32
    %116 = vector.broadcast %cst_59 : f32 to vector<8x128xf32>
    %117 = arith.maximumf %115, %116 : vector<8x128xf32>
    %118 = arith.truncf %117 : vector<8x128xf32> to vector<8x128xbf16>
    %c0_60 = arith.constant 0 : index
    %c0_61 = arith.constant 0 : index
    %119 = vector.load %arg5[%c0_60, %c0_61] : memref<128x128xbf16, #tpu.memory_space<vmem>>, vector<128x128xbf16>
    %cst_62 = arith.constant dense<0.000000e+00> : vector<8x128xf32>
    %120 = tpu.matmul %118, %119, %cst_62 {dimension_numbers = #tpu.dot_dimension_numbers<[1], [0], [0], [1], [0, 0, 1, 1], [], []>} : vector<8x128xbf16>, vector<128x128xbf16>, vector<8x128xf32> -> vector<8x128xf32>
    %c0_63 = arith.constant 0 : index
    %c0_64 = arith.constant 0 : index
    %121 = vector.load %arg6[%c0_63, %c0_64] : memref<1x128xf32, #tpu.memory_space<vmem>>, vector<1x128xf32>
    %122 = vector.broadcast %121 : vector<1x128xf32> to vector<8x128xf32>
    %123 = arith.addf %120, %122 : vector<8x128xf32>
    %cst_65 = arith.constant 0.000000e+00 : f32
    %124 = vector.broadcast %cst_65 : f32 to vector<8x128xf32>
    %125 = arith.maximumf %123, %124 : vector<8x128xf32>
    %126 = arith.truncf %125 : vector<8x128xf32> to vector<8x128xbf16>
    %c0_66 = arith.constant 0 : index
    %c0_67 = arith.constant 0 : index
    %127 = vector.load %arg7[%c0_66, %c0_67] : memref<128x128xbf16, #tpu.memory_space<vmem>>, vector<128x128xbf16>
    %cst_68 = arith.constant dense<0.000000e+00> : vector<8x128xf32>
    %128 = tpu.matmul %126, %127, %cst_68 {dimension_numbers = #tpu.dot_dimension_numbers<[1], [0], [0], [1], [0, 0, 1, 1], [], []>} : vector<8x128xbf16>, vector<128x128xbf16>, vector<8x128xf32> -> vector<8x128xf32>
    %c0_69 = arith.constant 0 : index
    %c0_70 = arith.constant 0 : index
    %129 = vector.load %arg8[%c0_69, %c0_70] : memref<1x128xf32, #tpu.memory_space<vmem>>, vector<1x128xf32>
    %130 = vector.broadcast %129 : vector<1x128xf32> to vector<8x128xf32>
    %131 = arith.addf %128, %130 : vector<8x128xf32>
    %c0_71 = arith.constant 0 : index
    %c0_72 = arith.constant 0 : index
    %132 = vector.load %arg9[%c0_71, %c0_72] : memref<8x128xf32, #tpu.memory_space<vmem>>, vector<8x128xf32>
    tpu.vector_store %arg9[%c0_71, %c0_72], %131 {strides = array<i32>} : memref<8x128xf32, #tpu.memory_space<vmem>>, vector<8x128xf32>,
    return
  }
}

</mosaic_0001>

<bundles_post_ra>
// kernel: _lambda_.3
= control target key start
LH: loop header
LB: loop body
LE: loop exit
PB: predicated region body
PF: predicated region fallthrough
CT: control target
= control target key end

     0   :  { %s2580_s12 = smov 0   ;;  %s2582_s13 = smov 0   ;;  %s2955_s0 = inlined_call_operand.vmem [shape: bf16[4,512,32], index: 0, kind: input, shape index: {}]   ;;  %s2956_s1 = inlined_call_operand.vmem [shape: bf16[32,128], index: 1, kind: input, shape index: {}]   ;;  %s2957_s2 = inlined_call_operand.vmem [shape: f32[1,128], index: 2, kind: input, shape index: {}]   ;;  %s2958_s3 = inlined_call_operand.vmem [shape: bf16[512,128], index: 3, kind: output, shape index: {}]  }
   0x1   :  { %s2584_s14 = smov 0  }
   0x2 LB: > { %s2002_s15 = sadd.s32 4294967295, %s2558_s14   ;;  %s2597_s16 = sadd.s32 1, %s2558_s14   ;;  %s2558_s14 = sphi %s2584_s14, %s2961_s14   ;;  %s2554_s13 = sphi %s2582_s13, %s2960_s13   ;;  %s2550_s12 = sphi %s2580_s12, %s2959_s12  }
   0x3   : > { %s17_s17 = ssub.s32 %s2558_s14, %s2597_s16  ;;  %s20_s18 = sadd.s32 1, %s2554_s13 }
   0x4   : > { %p18_p0 = scmp.eq.s32.totalorder %s17_s17, 0  ;;  %p27_p1 = scmp.ne.s32.totalorder %s2554_s13, %s2550_s12 }
   0x5   : > { %p28_p2 = scmp.eq.s32.totalorder %s2558_s14, 0  ;;  %p2005_p4 = scmp.ge.s32.totalorder %s2558_s14, 2 }
   0x6   : > { %s2606_s19 = scalar_select %p18_p0, %s2554_s13, %s20_s18  }
   0x7   : > { %p29_p3 = por %p28_p2, %p27_p1  ;;  %127 = sbr.rel (%p2005_p4) target bundleno = 80 (0x50), region = 24 }
   0xc   : > { %130 = sbr.rel (!%p29_p3) target bundleno = 80 (0x50), region = 28  ;;  %s132_s20 = sand.u32 (%p29_p3), 1, %s2554_s13  }
   0xd   : > { %s2343_s21 = sshll.u32 (%p29_p3), %s2558_s14, 7  ;;  %s2006_s22 = sshll.u32 (%p29_p3), %s132_s20, 9 }
   0xe   : > { %s2614_s25 = scalar_lea.vmem (%p29_p3), %s2955_s0, %s2343_s21  ;;  %s2619_s26 = scalar_lea.vmem (%p29_p3), [#allocation2], %s2006_s22 }
   0xf   : > { %v154_v0 = vld [vmem:[%s2614_s25] sm:$0xff] (%p29_p3)   ;;  %v158_v1 = vld [vmem:[%s2614_s25 + $0x8] sm:$0xff] (%p29_p3)   ;;  %v162_v2 = vld [vmem:[%s2614_s25 + $0x10] sm:$0xff] (%p29_p3)  }
  0x10   : > { %155 = vst [vmem:[%s2619_s26] sm:$0xff] (%p29_p3), %v154_v0   ;;  %v166_v3 = vld [vmem:[%s2614_s25 + $0x18] sm:$0xff] (%p29_p3)   ;;  %v170_v4 = vld [vmem:[%s2614_s25 + $0x20] sm:$0xff] (%p29_p3)   ;;  %v174_v5 = vld [vmem:[%s2614_s25 + $0x28] sm:$0xff] (%p29_p3)  }
  0x11   : > { %159 = vst [vmem:[%s2619_s26 + $0x8] sm:$0xff] %v158_v1   ;;  %v178_v6 = vld [vmem:[%s2614_s25 + $0x30] sm:$0xff]   ;;  %v182_v7 = vld [vmem:[%s2614_s25 + $0x38] sm:$0xff]   ;;  %v186_v8 = vld [vmem:[%s2614_s25 + $0x40] sm:$0xff]  }
  0x12   : > { %163 = vst [vmem:[%s2619_s26 + $0x10] sm:$0xff] %v162_v2   ;;  %v190_v9 = vld [vmem:[%s2614_s25 + $0x48] sm:$0xff]   ;;  %v194_v10 = vld [vmem:[%s2614_s25 + $0x50] sm:$0xff]   ;;  %v198_v11 = vld [vmem:[%s2614_s25 + $0x58] sm:$0xff]  }
  0x13   : > { %167 = vst [vmem:[%s2619_s26 + $0x18] sm:$0xff] %v166_v3   ;;  %v202_v12 = vld [vmem:[%s2614_s25 + $0x60] sm:$0xff]   ;;  %v206_v13 = vld [vmem:[%s2614_s25 + $0x68] sm:$0xff]   ;;  %v210_v14 = vld [vmem:[%s2614_s25 + $0x70] sm:$0xff]  }
  0x14   : > { %171 = vst [vmem:[%s2619_s26 + $0x20] sm:$0xff] %v170_v4   ;;  %v214_v15 = vld [vmem:[%s2614_s25 + $0x78] sm:$0xff]   ;;  %v218_v16 = vld [vmem:[%s2614_s25 + $0x100] sm:$0xff]   ;;  %v222_v17 = vld [vmem:[%s2614_s25 + $0x108] sm:$0xff]  }
  0x15   : > { %175 = vst [vmem:[%s2619_s26 + $0x28] sm:$0xff] %v174_v5   ;;  %v226_v18 = vld [vmem:[%s2614_s25 + $0x110] sm:$0xff]   ;;  %v230_v19 = vld [vmem:[%s2614_s25 + $0x118] sm:$0xff]   ;;  %v234_v20 = vld [vmem:[%s2614_s25 + $0x120] sm:$0xff]  }
  0x16   : > { %179 = vst [vmem:[%s2619_s26 + $0x30] sm:$0xff] %v178_v6   ;;  %v238_v21 = vld [vmem:[%s2614_s25 + $0x128] sm:$0xff]   ;;  %v242_v22 = vld [vmem:[%s2614_s25 + $0x130] sm:$0xff]   ;;  %v246_v23 = vld [vmem:[%s2614_s25 + $0x138] sm:$0xff]  }
  0x17   : > { %183 = vst [vmem:[%s2619_s26 + $0x38] sm:$0xff] %v182_v7   ;;  %v250_v24 = vld [vmem:[%s2614_s25 + $0x140] sm:$0xff]   ;;  %v254_v25 = vld [vmem:[%s2614_s25 + $0x148] sm:$0xff]   ;;  %v258_v26 = vld [vmem:[%s2614_s25 + $0x150] sm:$0xff]  }
  0x18   : > { %187 = vst [vmem:[%s2619_s26 + $0x40] sm:$0xff] %v186_v8   ;;  %v262_v27 = vld [vmem:[%s2614_s25 + $0x158] sm:$0xff]   ;;  %v266_v28 = vld [vmem:[%s2614_s25 + $0x160] sm:$0xff]   ;;  %v270_v29 = vld [vmem:[%s2614_s25 + $0x168] sm:$0xff]  }
  0x19   : > { %191 = vst [vmem:[%s2619_s26 + $0x48] sm:$0xff] %v190_v9   ;;  %v274_v30 = vld [vmem:[%s2614_s25 + $0x170] sm:$0xff]   ;;  %v278_v31 = vld [vmem:[%s2614_s25 + $0x178] sm:$0xff]   ;;  %v282_v32 = vld [vmem:[%s2614_s25 + $0x200] sm:$0xff]  }
  0x1a   : > { %195 = vst [vmem:[%s2619_s26 + $0x50] sm:$0xff] %v194_v10   ;;  %v286_v33 = vld [vmem:[%s2614_s25 + $0x208] sm:$0xff]   ;;  %v290_v34 = vld [vmem:[%s2614_s25 + $0x210] sm:$0xff]   ;;  %v294_v35 = vld [vmem:[%s2614_s25 + $0x218] sm:$0xff]  }
  0x1b   : > { %199 = vst [vmem:[%s2619_s26 + $0x58] sm:$0xff] %v198_v11   ;;  %v298_v36 = vld [vmem:[%s2614_s25 + $0x220] sm:$0xff]   ;;  %v302_v37 = vld [vmem:[%s2614_s25 + $0x228] sm:$0xff]   ;;  %v306_v38 = vld [vmem:[%s2614_s25 + $0x230] sm:$0xff]  }
  0x1c   : > { %203 = vst [vmem:[%s2619_s26 + $0x60] sm:$0xff] %v202_v12   ;;  %v310_v39 = vld [vmem:[%s2614_s25 + $0x238] sm:$0xff]   ;;  %v314_v40 = vld [vmem:[%s2614_s25 + $0x240] sm:$0xff]   ;;  %v318_v41 = vld [vmem:[%s2614_s25 + $0x248] sm:$0xff]  }
  0x1d   : > { %207 = vst [vmem:[%s2619_s26 + $0x68] sm:$0xff] %v206_v13   ;;  %v322_v42 = vld [vmem:[%s2614_s25 + $0x250] sm:$0xff]   ;;  %v326_v43 = vld [vmem:[%s2614_s25 + $0x258] sm:$0xff]   ;;  %v330_v44 = vld [vmem:[%s2614_s25 + $0x260] sm:$0xff]  }
  0x1e   : > { %211 = vst [vmem:[%s2619_s26 + $0x70] sm:$0xff] %v210_v14   ;;  %v334_v45 = vld [vmem:[%s2614_s25 + $0x268] sm:$0xff]   ;;  %v338_v46 = vld [vmem:[%s2614_s25 + $0x270] sm:$0xff]   ;;  %v342_v47 = vld [vmem:[%s2614_s25 + $0x278] sm:$0xff]  }
  0x1f   : > { %215 = vst [vmem:[%s2619_s26 + $0x78] sm:$0xff] %v214_v15   ;;  %v346_v48 = vld [vmem:[%s2614_s25 + $0x300] sm:$0xff]   ;;  %v350_v49 = vld [vmem:[%s2614_s25 + $0x308] sm:$0xff]   ;;  %v354_v50 = vld [vmem:[%s2614_s25 + $0x310] sm:$0xff]  }
  0x20   : > { %219 = vst [vmem:[%s2619_s26 + $0x80] sm:$0xff] %v218_v16   ;;  %v358_v51 = vld [vmem:[%s2614_s25 + $0x318] sm:$0xff]   ;;  %v362_v52 = vld [vmem:[%s2614_s25 + $0x320] sm:$0xff]   ;;  %v366_v53 = vld [vmem:[%s2614_s25 + $0x328] sm:$0xff]  }
  0x21   : > { %223 = vst [vmem:[%s2619_s26 + $0x88] sm:$0xff] %v222_v17   ;;  %v370_v54 = vld [vmem:[%s2614_s25 + $0x330] sm:$0xff]   ;;  %v374_v55 = vld [vmem:[%s2614_s25 + $0x338] sm:$0xff]   ;;  %v378_v56 = vld [vmem:[%s2614_s25 + $0x340] sm:$0xff]  }
  0x22   : > { %227 = vst [vmem:[%s2619_s26 + $0x90] sm:$0xff] %v226_v18   ;;  %v382_v57 = vld [vmem:[%s2614_s25 + $0x348] sm:$0xff]   ;;  %v386_v58 = vld [vmem:[%s2614_s25 + $0x350] sm:$0xff]   ;;  %v390_v59 = vld [vmem:[%s2614_s25 + $0x358] sm:$0xff]  }
  0x23   : > { %231 = vst [vmem:[%s2619_s26 + $0x98] sm:$0xff] %v230_v19   ;;  %v394_v60 = vld [vmem:[%s2614_s25 + $0x360] sm:$0xff]   ;;  %v398_v61 = vld [vmem:[%s2614_s25 + $0x368] sm:$0xff]   ;;  %v402_v62 = vld [vmem:[%s2614_s25 + $0x370] sm:$0xff]  }
  0x24   : > { %235 = vst [vmem:[%s2619_s26 + $0xa0] sm:$0xff] %v234_v20   ;;  %v406_v63 = vld [vmem:[%s2614_s25 + $0x378] sm:$0xff]  }
  0x25   : > { %239 = vst [vmem:[%s2619_s26 + $0xa8] sm:$0xff] %v238_v21  }
  0x26   : > { %243 = vst [vmem:[%s2619_s26 + $0xb0] sm:$0xff] %v242_v22  }
  0x27   : > { %247 = vst [vmem:[%s2619_s26 + $0xb8] sm:$0xff] %v246_v23  }
  0x28   : > { %251 = vst [vmem:[%s2619_s26 + $0xc0] sm:$0xff] %v250_v24  }
  0x29   : > { %255 = vst [vmem:[%s2619_s26 + $0xc8] sm:$0xff] %v254_v25  }
  0x2a   : > { %259 = vst [vmem:[%s2619_s26 + $0xd0] sm:$0xff] %v258_v26  }
  0x2b   : > { %263 = vst [vmem:[%s2619_s26 + $0xd8] sm:$0xff] %v262_v27  }
  0x2c   : > { %267 = vst [vmem:[%s2619_s26 + $0xe0] sm:$0xff] %v266_v28  }
  0x2d   : > { %271 = vst [vmem:[%s2619_s26 + $0xe8] sm:$0xff] %v270_v29  }
  0x2e   : > { %275 = vst [vmem:[%s2619_s26 + $0xf0] sm:$0xff] %v274_v30  }
  0x2f   : > { %279 = vst [vmem:[%s2619_s26 + $0xf8] sm:$0xff] %v278_v31  }
  0x30   : > { %283 = vst [vmem:[%s2619_s26 + $0x100] sm:$0xff] %v282_v32  }
  0x31   : > { %287 = vst [vmem:[%s2619_s26 + $0x108] sm:$0xff] %v286_v33  }
  0x32   : > { %291 = vst [vmem:[%s2619_s26 + $0x110] sm:$0xff] %v290_v34  }
  0x33   : > { %295 = vst [vmem:[%s2619_s26 + $0x118] sm:$0xff] %v294_v35  }
  0x34   : > { %299 = vst [vmem:[%s2619_s26 + $0x120] sm:$0xff] %v298_v36  }
  0x35   : > { %303 = vst [vmem:[%s2619_s26 + $0x128] sm:$0xff] %v302_v37  }
  0x36   : > { %307 = vst [vmem:[%s2619_s26 + $0x130] sm:$0xff] %v306_v38  }
  0x37   : > { %311 = vst [vmem:[%s2619_s26 + $0x138] sm:$0xff] %v310_v39  }
  0x38   : > { %315 = vst [vmem:[%s2619_s26 + $0x140] sm:$0xff] %v314_v40  }
  0x39   : > { %319 = vst [vmem:[%s2619_s26 + $0x148] sm:$0xff] %v318_v41  }
  0x3a   : > { %323 = vst [vmem:[%s2619_s26 + $0x150] sm:$0xff] %v322_v42  }
  0x3b   : > { %327 = vst [vmem:[%s2619_s26 + $0x158] sm:$0xff] %v326_v43  }
  0x3c   : > { %331 = vst [vmem:[%s2619_s26 + $0x160] sm:$0xff] %v330_v44  }
  0x3d   : > { %335 = vst [vmem:[%s2619_s26 + $0x168] sm:$0xff] %v334_v45  }
  0x3e   : > { %339 = vst [vmem:[%s2619_s26 + $0x170] sm:$0xff] %v338_v46  }
  0x3f   : > { %343 = vst [vmem:[%s2619_s26 + $0x178] sm:$0xff] %v342_v47  }
  0x40   : > { %347 = vst [vmem:[%s2619_s26 + $0x180] sm:$0xff] %v346_v48  }
  0x41   : > { %351 = vst [vmem:[%s2619_s26 + $0x188] sm:$0xff] %v350_v49  }
  0x42   : > { %355 = vst [vmem:[%s2619_s26 + $0x190] sm:$0xff] %v354_v50  }
  0x43   : > { %359 = vst [vmem:[%s2619_s26 + $0x198] sm:$0xff] %v358_v51  }
  0x44   : > { %363 = vst [vmem:[%s2619_s26 + $0x1a0] sm:$0xff] %v362_v52  }
  0x45   : > { %367 = vst [vmem:[%s2619_s26 + $0x1a8] sm:$0xff] %v366_v53  }
  0x46   : > { %371 = vst [vmem:[%s2619_s26 + $0x1b0] sm:$0xff] %v370_v54  }
  0x47   : > { %375 = vst [vmem:[%s2619_s26 + $0x1b8] sm:$0xff] %v374_v55  }
  0x48   : > { %379 = vst [vmem:[%s2619_s26 + $0x1c0] sm:$0xff] %v378_v56  }
  0x49   : > { %383 = vst [vmem:[%s2619_s26 + $0x1c8] sm:$0xff] %v382_v57  }
  0x4a   : > { %387 = vst [vmem:[%s2619_s26 + $0x1d0] sm:$0xff] %v386_v58  }
  0x4b   : > { %391 = vst [vmem:[%s2619_s26 + $0x1d8] sm:$0xff] %v390_v59  }
  0x4c   : > { %395 = vst [vmem:[%s2619_s26 + $0x1e0] sm:$0xff] %v394_v60  }
  0x4d   : > { %399 = vst [vmem:[%s2619_s26 + $0x1e8] sm:$0xff] %v398_v61  }
  0x4e   : > { %403 = vst [vmem:[%s2619_s26 + $0x1f0] sm:$0xff] %v402_v62  }
  0x4f   : > { %407 = vst [vmem:[%s2619_s26 + $0x1f8] sm:$0xff] %v406_v63  }
  0x50 PF: > { %p2009_p5 = scmp.ge.s32.totalorder %s2558_s14, 1  ;;  %p688_p6 = scmp.lt.s32.totalorder %s2558_s14, 3 }
  0x52   : > { %p689_p7 = pnand %p2009_p5, %p688_p6 }
  0x53   : > { %s695_s29 = sand.u32 (!%p689_p7), 1, %s2550_s12   ;;  %s2011_s7 = sshll.u32 (!%p689_p7), %s2002_s15, 5 }
  0x54   : > { %692 = sbr.rel (%p689_p7) target bundleno = 489 (0x1e9), region = 69  ;;  %s2010_s30 = sshll.u32 (!%p689_p7), %s695_s29, 9 }
  0x55   : > { %s2755_s6 = scalar_lea.vmem (!%p689_p7), [#allocation2], %s2010_s30  ;;  %p720_p8 = scmp.lt.s32.totalorder (!%p689_p7), %s2011_s7, 63 }
  0x59   : > { %v2409_v0 = vld [vmem:[%s2956_s1 + $0x8] sm:$0xff]  ;;  %v2408_v1 = vld [vmem:[%s2956_s1] sm:$0xff]  ;;  %vm1190_vm0 = vcmask 261120   ;;  %v2346_v10 = vld [vmem:[%s2755_s6 + $0x10] sm:$0xff]  ;;  %s2963_s7 = smov (!%p720_p8, %s2011_s7), 63 }
  0x5a   : > { %1389 = vmatpush.bf16.msra.mxu0 %v2409_v0  ;;  %2505 = vmatpush.bf16.msra.mxu1 %v2409_v0  ;;  %v2344_v2 = vld [vmem:[%s2755_s6] sm:$0xff]  ;;  %v2345_v6 = vld [vmem:[%s2755_s6 + $0x8] sm:$0xff]  ;;  %v2362_v11 = vld [vmem:[%s2755_s6 + $0x90] sm:$0xff]  ;;  %s2012_s10 = sshll.u32 %s2963_s7, 2 }
  0x5b   : > { %2506 = vmatpush.bf16.msra.mxu2 %v2409_v0  ;;  %2507 = vmatpush.bf16.msra.mxu3 %v2409_v0  ;;  %v2360_v3 = vld [vmem:[%s2755_s6 + $0x80] sm:$0xff]  ;;  %v2361_v7 = vld [vmem:[%s2755_s6 + $0x88] sm:$0xff]  ;;  %v2378_v12 = vld [vmem:[%s2755_s6 + $0x110] sm:$0xff]  ;;  %s2849_s14 = scalar_lea.vmem %s2958_s3, %s2012_s10 }
  0x5c   : > { %v2376_v4 = vld [vmem:[%s2755_s6 + $0x100] sm:$0xff]  ;;  %v2377_v8 = vld [vmem:[%s2755_s6 + $0x108] sm:$0xff]  ;;  %v2394_v13 = vld [vmem:[%s2755_s6 + $0x190] sm:$0xff] }
  0x5d   : > { %v2392_v5 = vld [vmem:[%s2755_s6 + $0x180] sm:$0xff]  ;;  %v2393_v9 = vld [vmem:[%s2755_s6 + $0x188] sm:$0xff]  ;;  %v2347_v14 = vld [vmem:[%s2755_s6 + $0x18] sm:$0xff] }
  0x5e   : > { %1390 = vmatpush.bf16.msra.mxu0 %v2408_v1  ;;  %2508 = vmatpush.bf16.msra.mxu1 %v2408_v1  ;;  %v2363_v15 = vld [vmem:[%s2755_s6 + $0x98] sm:$0xff]  ;;  %v2348_v18 = vld [vmem:[%s2755_s6 + $0x20] sm:$0xff]  ;;  %v2349_v22 = vld [vmem:[%s2755_s6 + $0x28] sm:$0xff] }
  0x5f   : > { %2509 = vmatpush.bf16.msra.mxu2 %v2408_v1  ;;  %2510 = vmatpush.bf16.msra.mxu3 %v2408_v1  ;;  %v2379_v16 = vld [vmem:[%s2755_s6 + $0x118] sm:$0xff]  ;;  %v2364_v19 = vld [vmem:[%s2755_s6 + $0xa0] sm:$0xff]  ;;  %v2365_v23 = vld [vmem:[%s2755_s6 + $0xa8] sm:$0xff] }
  0x60   : > { %v2395_v17 = vld [vmem:[%s2755_s6 + $0x198] sm:$0xff]  ;;  %v2380_v20 = vld [vmem:[%s2755_s6 + $0x120] sm:$0xff]  ;;  %v2381_v24 = vld [vmem:[%s2755_s6 + $0x128] sm:$0xff] }
  0x61   : > { %2277 = vmatmul.msk.bf16.vlgmr.msra.gmra.mxu0 %vm1190_vm0, %v2344_v2  ;;  %2293 = vmatmul.msk.bf16.vlgmr.msra.gmra.mxu1 %vm1190_vm0, %v2360_v3  ;;  %v2396_v21 = vld [vmem:[%s2755_s6 + $0x1a0] sm:$0xff]  ;;  %v2397_v25 = vld [vmem:[%s2755_s6 + $0x1a8] sm:$0xff]  ;;  %v2350_v26 = vld [vmem:[%s2755_s6 + $0x30] sm:$0xff] }
  0x62   : > { %2309 = vmatmul.msk.bf16.vlgmr.msra.gmra.mxu2 %vm1190_vm0, %v2376_v4  ;;  %2325 = vmatmul.msk.bf16.vlgmr.msra.gmra.mxu3 %vm1190_vm0, %v2392_v5  ;;  %v2366_v27 = vld [vmem:[%s2755_s6 + $0xb0] sm:$0xff]  ;;  %v2351_v30 = vld [vmem:[%s2755_s6 + $0x38] sm:$0xff]  ;;  %v2352_v34 = vld [vmem:[%s2755_s6 + $0x40] sm:$0xff] }
  0x63   : > { %v2382_v28 = vld [vmem:[%s2755_s6 + $0x130] sm:$0xff]  ;;  %v2367_v31 = vld [vmem:[%s2755_s6 + $0xb8] sm:$0xff]  ;;  %v2368_v35 = vld [vmem:[%s2755_s6 + $0xc0] sm:$0xff] }
  0x64   : > { %v2398_v29 = vld [vmem:[%s2755_s6 + $0x1b0] sm:$0xff]  ;;  %v2383_v32 = vld [vmem:[%s2755_s6 + $0x138] sm:$0xff]  ;;  %v2384_v38 = vld [vmem:[%s2755_s6 + $0x140] sm:$0xff] }
  0x65   : > { %v2399_v33 = vld [vmem:[%s2755_s6 + $0x1b8] sm:$0xff]  ;;  %v2400_v39 = vld [vmem:[%s2755_s6 + $0x1c0] sm:$0xff]  ;;  %v2353_v50 = vld [vmem:[%s2755_s6 + $0x48] sm:$0xff] }
  0x66   : > { %v2834_v47 = vld [vmem:[%s2957_s2] ss:$0 sm:$0xff]  ;;  %v2369_v51 = vld [vmem:[%s2755_s6 + $0xc8] sm:$0xff] }
  0x67   : > { %v2385_v56 = vld [vmem:[%s2755_s6 + $0x148] sm:$0xff] }
  0x68   : > { %v2401_v57 = vld [vmem:[%s2755_s6 + $0x1c8] sm:$0xff] }
  0x71   : > { %2278 = vmatmul.msk.bf16.gmra.mxu0 %vm1190_vm0, %v2345_v6  ;;  %2294 = vmatmul.msk.bf16.gmra.mxu1 %vm1190_vm0, %v2361_v7 }
  0x72   : > { %2310 = vmatmul.msk.bf16.gmra.mxu2 %vm1190_vm0, %v2377_v8  ;;  %2326 = vmatmul.msk.bf16.gmra.mxu3 %vm1190_vm0, %v2393_v9  ;;  %v2354_v9 = vld [vmem:[%s2755_s6 + $0x50] sm:$0xff] }
  0x81   : > { %2279 = vmatmul.msk.bf16.gmra.mxu0 %vm1190_vm0, %v2346_v10  ;;  %2295 = vmatmul.msk.bf16.gmra.mxu1 %vm1190_vm0, %v2362_v11  ;;  %v2370_v10 = vld [vmem:[%s2755_s6 + $0xd0] sm:$0xff] }
  0x82   : > { %2311 = vmatmul.msk.bf16.gmra.mxu2 %vm1190_vm0, %v2378_v12  ;;  %2327 = vmatmul.msk.bf16.gmra.mxu3 %vm1190_vm0, %v2394_v13 }
  0x91   : > { %2280 = vmatmul.msk.bf16.gmra.mxu0 %vm1190_vm0, %v2347_v14  ;;  %2296 = vmatmul.msk.bf16.gmra.mxu1 %vm1190_vm0, %v2363_v15  ;;  %v2386_v15 = vld [vmem:[%s2755_s6 + $0x150] sm:$0xff] }
  0x92   : > { %2312 = vmatmul.msk.bf16.gmra.mxu2 %vm1190_vm0, %v2379_v16  ;;  %2328 = vmatmul.msk.bf16.gmra.mxu3 %vm1190_vm0, %v2395_v17  ;;  %v2402_v16 = vld [vmem:[%s2755_s6 + $0x1d0] sm:$0xff] }
  0xa1   : > { %2281 = vmatmul.msk.bf16.gmra.mxu0 %vm1190_vm0, %v2348_v18  ;;  %2297 = vmatmul.msk.bf16.gmra.mxu1 %vm1190_vm0, %v2364_v19 }
  0xa2   : > { %2313 = vmatmul.msk.bf16.gmra.mxu2 %vm1190_vm0, %v2380_v20  ;;  %2329 = vmatmul.msk.bf16.gmra.mxu3 %vm1190_vm0, %v2396_v21 }
  0xb1   : > { %2282 = vmatmul.msk.bf16.gmra.mxu0 %vm1190_vm0, %v2349_v22  ;;  %2298 = vmatmul.msk.bf16.gmra.mxu1 %vm1190_vm0, %v2365_v23 }
  0xb2   : > { %2314 = vmatmul.msk.bf16.gmra.mxu2 %vm1190_vm0, %v2381_v24  ;;  %2330 = vmatmul.msk.bf16.gmra.mxu3 %vm1190_vm0, %v2397_v25 }
  0xc1   : > { %2283 = vmatmul.msk.bf16.gmra.mxu0 %vm1190_vm0, %v2350_v26  ;;  %2299 = vmatmul.msk.bf16.gmra.mxu1 %vm1190_vm0, %v2366_v27 }
  0xc2   : > { %2315 = vmatmul.msk.bf16.gmra.mxu2 %vm1190_vm0, %v2382_v28  ;;  %2331 = vmatmul.msk.bf16.gmra.mxu3 %vm1190_vm0, %v2398_v29 }
  0xd1   : > { %2284 = vmatmul.msk.bf16.gmra.mxu0 %vm1190_vm0, %v2351_v30  ;;  %2300 = vmatmul.msk.bf16.gmra.mxu1 %vm1190_vm0, %v2367_v31 }
  0xd2   : > { %2316 = vmatmul.msk.bf16.gmra.mxu2 %vm1190_vm0, %v2383_v32  ;;  %2332 = vmatmul.msk.bf16.gmra.mxu3 %vm1190_vm0, %v2399_v33  ;;  %v2355_v32 = vld [vmem:[%s2755_s6 + $0x58] sm:$0xff] }
  0xd3   : > { %v2371_v33 = vld [vmem:[%s2755_s6 + $0xd8] sm:$0xff] }
  0xde   : > { %v1392_v36 = vpop.f32.mrf.mxu0  ;;  %v1472_v37 = vpop.f32.mrf.mxu1 }
  0xdf   : > { %v1712_v44 = vmax.f32 %v1392_v36, %v1472_v37 }
  0xe1   : > { %2285 = vmatmul.msk.bf16.gmra.mxu0 %vm1190_vm0, %v2352_v34  ;;  %2301 = vmatmul.msk.bf16.gmra.mxu1 %vm1190_vm0, %v2368_v35 }
  0xe2   : > { %2317 = vmatmul.msk.bf16.gmra.mxu2 %vm1190_vm0, %v2384_v38  ;;  %2333 = vmatmul.msk.bf16.gmra.mxu3 %vm1190_vm0, %v2400_v39  ;;  %v2387_v38 = vld [vmem:[%s2755_s6 + $0x158] sm:$0xff] }
  0xe3   : > { %v2403_v39 = vld [vmem:[%s2755_s6 + $0x1d8] sm:$0xff] }
  0xe5   : > { %v1552_v40 = vpop.f32.mrf.mxu2  ;;  %v1632_v41 = vpop.f32.mrf.mxu3 }
  0xe6   : > { %v1394_v42 = vpop.f32.mrf.mxu0  ;;  %v1474_v43 = vpop.f32.mrf.mxu1  ;;  %v1744_v45 = vmax.f32 %v1552_v40, %v1632_v41 }
  0xe7   : > { %v1713_v52 = vmax.f32 %v1394_v42, %v1474_v43 }
  0xe8   : > { %v1776_v46 = vmax.f32 %v1712_v44, %v1744_v45 }
  0xea   : > { %v1812_v58 = vadd.f32 %v2834_v47, %v1776_v46 }
  0xec   : > { %v1844_v61 = vmax.f32 %v1812_v58, 0.0 }
  0xed   : > { %v1554_v48 = vpop.f32.mrf.mxu2  ;;  %v1634_v49 = vpop.f32.mrf.mxu3 }
  0xee   : > { %v1745_v53 = vmax.f32 %v1554_v48, %v1634_v49  ;;  %v1397_v54 = vpop.f32.mrf.mxu0  ;;  %v1477_v55 = vpop.f32.mrf.mxu1 }
  0xef   : > { %v1714_v4 = vmax.f32 %v1397_v54, %v1477_v55 }
  0xf0   : > { %v1777_v59 = vmax.f32 %v1713_v52, %v1745_v53 }
  0xf1   : > { %2286 = vmatmul.msk.bf16.gmra.mxu0 %vm1190_vm0, %v2353_v50  ;;  %2302 = vmatmul.msk.bf16.gmra.mxu1 %vm1190_vm0, %v2369_v51 }
  0xf2   : > { %v1813_v60 = vadd.f32 %v2834_v47, %v1777_v59  ;;  %2318 = vmatmul.msk.bf16.gmra.mxu2 %vm1190_vm0, %v2385_v56  ;;  %2334 = vmatmul.msk.bf16.gmra.mxu3 %vm1190_vm0, %v2401_v57  ;;  %v2356_v56 = vld [vmem:[%s2755_s6 + $0x60] sm:$0xff] }
  0xf3   : > { %v2372_v57 = vld [vmem:[%s2755_s6 + $0xe0] sm:$0xff] }
  0xf4   : > { %v1845_v62 = vmax.f32 %v1813_v60, 0.0 }
  0xf5   : > { %v1557_v63 = vpop.f32.mrf.mxu2  ;;  %v1637_v0 = vpop.f32.mrf.mxu3 }
  0xf6   : > { %v2413_v1 = vpack.c.bf16 %v1845_v62, %v1844_v61  ;;  %v1399_v2 = vpop.f32.mrf.mxu0  ;;  %v1479_v3 = vpop.f32.mrf.mxu1  ;;  %v1746_v5 = vmax.f32 %v1557_v63, %v1637_v0  ;;  %v2388_v62 = vld [vmem:[%s2755_s6 + $0x160] sm:$0xff] }
  0xf7   : > { %v1715_v11 = vmax.f32 %v1399_v2, %v1479_v3  ;;  %v2404_v63 = vld [vmem:[%s2755_s6 + $0x1e0] sm:$0xff] }
  0xf8   : > { %2414 = vst [vmem:[%s2849_s14] sm:$0xff] %v2413_v1   ;;  %v1778_v6 = vmax.f32 %v1714_v4, %v1746_v5 }
  0xfa   : > { %v1814_v17 = vadd.f32 %v2834_v47, %v1778_v6 }
  0xfc   : > { %v1846_v20 = vmax.f32 %v1814_v17, 0.0 }
  0xfd   : > { %v1559_v7 = vpop.f32.mrf.mxu2  ;;  %v1639_v8 = vpop.f32.mrf.mxu3 }
  0xfe   : > { %v1747_v12 = vmax.f32 %v1559_v7, %v1639_v8  ;;  %v1402_v13 = vpop.f32.mrf.mxu0  ;;  %v1482_v14 = vpop.f32.mrf.mxu1 }
  0xff   : > { %v1716_v27 = vmax.f32 %v1402_v13, %v1482_v14 }
 0x100   : > { %v1779_v18 = vmax.f32 %v1715_v11, %v1747_v12 }
 0x101   : > { %2287 = vmatmul.msk.bf16.gmra.mxu0 %vm1190_vm0, %v2354_v9  ;;  %2303 = vmatmul.msk.bf16.gmra.mxu1 %vm1190_vm0, %v2370_v10 }
 0x102   : > { %v1815_v19 = vadd.f32 %v2834_v47, %v1779_v18  ;;  %2319 = vmatmul.msk.bf16.gmra.mxu2 %vm1190_vm0, %v2386_v15  ;;  %2335 = vmatmul.msk.bf16.gmra.mxu3 %vm1190_vm0, %v2402_v16  ;;  %v2357_v15 = vld [vmem:[%s2755_s6 + $0x68] sm:$0xff] }
 0x103   : > { %v2373_v16 = vld [vmem:[%s2755_s6 + $0xe8] sm:$0xff] }
 0x104   : > { %v1847_v21 = vmax.f32 %v1815_v19, 0.0 }
 0x105   : > { %v1562_v22 = vpop.f32.mrf.mxu2  ;;  %v1642_v23 = vpop.f32.mrf.mxu3 }
 0x106   : > { %v2418_v24 = vpack.c.bf16 %v1847_v21, %v1846_v20  ;;  %v1404_v25 = vpop.f32.mrf.mxu0  ;;  %v1484_v26 = vpop.f32.mrf.mxu1  ;;  %v1748_v28 = vmax.f32 %v1562_v22, %v1642_v23  ;;  %v2389_v21 = vld [vmem:[%s2755_s6 + $0x168] sm:$0xff] }
 0x107   : > { %v1717_v34 = vmax.f32 %v1404_v25, %v1484_v26  ;;  %v2405_v22 = vld [vmem:[%s2755_s6 + $0x1e8] sm:$0xff] }
 0x108   : > { %2490 = vst [vmem:[%s2849_s14 + $0x8] sm:$0xff] %v2418_v24   ;;  %v1780_v29 = vmax.f32 %v1716_v27, %v1748_v28 }
 0x10a   : > { %v1816_v40 = vadd.f32 %v2834_v47, %v1780_v29 }
 0x10c   : > { %v1848_v43 = vmax.f32 %v1816_v40, 0.0 }
 0x10d   : > { %v1564_v30 = vpop.f32.mrf.mxu2  ;;  %v1644_v31 = vpop.f32.mrf.mxu3 }
 0x10e   : > { %v1749_v35 = vmax.f32 %v1564_v30, %v1644_v31  ;;  %v1407_v36 = vpop.f32.mrf.mxu0  ;;  %v1487_v37 = vpop.f32.mrf.mxu1 }
 0x10f   : > { %v1718_v51 = vmax.f32 %v1407_v36, %v1487_v37 }
 0x110   : > { %v1781_v41 = vmax.f32 %v1717_v34, %v1749_v35 }
 0x111   : > { %2288 = vmatmul.msk.bf16.gmra.mxu0 %vm1190_vm0, %v2355_v32  ;;  %2304 = vmatmul.msk.bf16.gmra.mxu1 %vm1190_vm0, %v2371_v33 }
 0x112   : > { %v1817_v42 = vadd.f32 %v2834_v47, %v1781_v41  ;;  %2320 = vmatmul.msk.bf16.gmra.mxu2 %vm1190_vm0, %v2387_v38  ;;  %2336 = vmatmul.msk.bf16.gmra.mxu3 %vm1190_vm0, %v2403_v39  ;;  %v2358_v38 = vld [vmem:[%s2755_s6 + $0x70] sm:$0xff] }
 0x113   : > { %v2374_v39 = vld [vmem:[%s2755_s6 + $0xf0] sm:$0xff] }
 0x114   : > { %v1849_v44 = vmax.f32 %v1817_v42, 0.0 }
 0x115   : > { %v1567_v45 = vpop.f32.mrf.mxu2  ;;  %v1647_v46 = vpop.f32.mrf.mxu3 }
 0x116   : > { %v2423_v48 = vpack.c.bf16 %v1849_v44, %v1848_v43  ;;  %v1409_v49 = vpop.f32.mrf.mxu0  ;;  %v1489_v50 = vpop.f32.mrf.mxu1  ;;  %v1750_v52 = vmax.f32 %v1567_v45, %v1647_v46  ;;  %v2390_v44 = vld [vmem:[%s2755_s6 + $0x170] sm:$0xff] }
 0x117   : > { %v1719_v58 = vmax.f32 %v1409_v49, %v1489_v50  ;;  %v2406_v45 = vld [vmem:[%s2755_s6 + $0x1f0] sm:$0xff] }
 0x118   : > { %2491 = vst [vmem:[%s2849_s14 + $0x10] sm:$0xff] %v2423_v48   ;;  %v1782_v53 = vmax.f32 %v1718_v51, %v1750_v52 }
 0x11a   : > { %v1818_v0 = vadd.f32 %v2834_v47, %v1782_v53 }
 0x11c   : > { %v1850_v3 = vmax.f32 %v1818_v0, 0.0 }
 0x11d   : > { %v1569_v54 = vpop.f32.mrf.mxu2  ;;  %v1649_v55 = vpop.f32.mrf.mxu3 }
 0x11e   : > { %v1751_v59 = vmax.f32 %v1569_v54, %v1649_v55  ;;  %v1412_v60 = vpop.f32.mrf.mxu0  ;;  %v1492_v61 = vpop.f32.mrf.mxu1 }
 0x11f   : > { %v1720_v10 = vmax.f32 %v1412_v60, %v1492_v61 }
 0x120   : > { %v1783_v1 = vmax.f32 %v1719_v58, %v1751_v59 }
 0x121   : > { %2289 = vmatmul.msk.bf16.gmra.mxu0 %vm1190_vm0, %v2356_v56  ;;  %2305 = vmatmul.msk.bf16.gmra.mxu1 %vm1190_vm0, %v2372_v57 }
 0x122   : > { %v1819_v2 = vadd.f32 %v2834_v47, %v1783_v1  ;;  %2321 = vmatmul.msk.bf16.gmra.mxu2 %vm1190_vm0, %v2388_v62  ;;  %2337 = vmatmul.msk.bf16.gmra.mxu3 %vm1190_vm0, %v2404_v63  ;;  %v2359_v62 = vld [vmem:[%s2755_s6 + $0x78] sm:$0xff] }
 0x123   : > { %v2375_v63 = vld [vmem:[%s2755_s6 + $0xf8] sm:$0xff] }
 0x124   : > { %v1851_v4 = vmax.f32 %v1819_v2, 0.0 }
 0x125   : > { %v1572_v5 = vpop.f32.mrf.mxu2  ;;  %v1652_v6 = vpop.f32.mrf.mxu3 }
 0x126   : > { %v2428_v7 = vpack.c.bf16 %v1851_v4, %v1850_v3  ;;  %v1414_v8 = vpop.f32.mrf.mxu0  ;;  %v1494_v9 = vpop.f32.mrf.mxu1  ;;  %v1752_v11 = vmax.f32 %v1572_v5, %v1652_v6  ;;  %v2391_v4 = vld [vmem:[%s2755_s6 + $0x178] sm:$0xff] }
 0x127   : > { %v1721_v17 = vmax.f32 %v1414_v8, %v1494_v9  ;;  %v2407_v5 = vld [vmem:[%s2755_s6 + $0x1f8] sm:$0xff] }
 0x128   : > { %2492 = vst [vmem:[%s2849_s14 + $0x18] sm:$0xff] %v2428_v7   ;;  %v1784_v12 = vmax.f32 %v1720_v10, %v1752_v11 }
 0x12a   : > { %v1820_v23 = vadd.f32 %v2834_v47, %v1784_v12 }
 0x12c   : > { %v1852_v26 = vmax.f32 %v1820_v23, 0.0 }
 0x12d   : > { %v1574_v13 = vpop.f32.mrf.mxu2  ;;  %v1654_v14 = vpop.f32.mrf.mxu3 }
 0x12e   : > { %v1753_v18 = vmax.f32 %v1574_v13, %v1654_v14  ;;  %v1417_v19 = vpop.f32.mrf.mxu0  ;;  %v1497_v20 = vpop.f32.mrf.mxu1 }
 0x12f   : > { %v1722_v33 = vmax.f32 %v1417_v19, %v1497_v20 }
 0x130   : > { %v1785_v24 = vmax.f32 %v1721_v17, %v1753_v18 }
 0x131   : > { %2290 = vmatmul.msk.bf16.gmra.mxu0 %vm1190_vm0, %v2357_v15  ;;  %2306 = vmatmul.msk.bf16.gmra.mxu1 %vm1190_vm0, %v2373_v16 }
 0x132   : > { %v1821_v25 = vadd.f32 %v2834_v47, %v1785_v24  ;;  %2322 = vmatmul.msk.bf16.gmra.mxu2 %vm1190_vm0, %v2389_v21  ;;  %2338 = vmatmul.msk.bf16.gmra.mxu3 %vm1190_vm0, %v2405_v22 }
 0x134   : > { %v1853_v27 = vmax.f32 %v1821_v25, 0.0 }
 0x135   : > { %v1577_v28 = vpop.f32.mrf.mxu2  ;;  %v1657_v29 = vpop.f32.mrf.mxu3 }
 0x136   : > { %v2433_v30 = vpack.c.bf16 %v1853_v27, %v1852_v26  ;;  %v1419_v31 = vpop.f32.mrf.mxu0  ;;  %v1499_v32 = vpop.f32.mrf.mxu1  ;;  %v1754_v34 = vmax.f32 %v1577_v28, %v1657_v29 }
 0x137   : > { %v1723_v40 = vmax.f32 %v1419_v31, %v1499_v32 }
 0x138   : > { %2493 = vst [vmem:[%s2849_s14 + $0x20] sm:$0xff] %v2433_v30   ;;  %v1786_v35 = vmax.f32 %v1722_v33, %v1754_v34 }
 0x13a   : > { %v1822_v46 = vadd.f32 %v2834_v47, %v1786_v35 }
 0x13c   : > { %v1854_v50 = vmax.f32 %v1822_v46, 0.0 }
 0x13d   : > { %v1579_v36 = vpop.f32.mrf.mxu2  ;;  %v1659_v37 = vpop.f32.mrf.mxu3 }
 0x13e   : > { %v1755_v41 = vmax.f32 %v1579_v36, %v1659_v37  ;;  %v1422_v42 = vpop.f32.mrf.mxu0  ;;  %v1502_v43 = vpop.f32.mrf.mxu1 }
 0x13f   : > { %v1724_v57 = vmax.f32 %v1422_v42, %v1502_v43 }
 0x140   : > { %v1787_v48 = vmax.f32 %v1723_v40, %v1755_v41 }
 0x141   : > { %2291 = vmatmul.msk.bf16.gmra.mxu0 %vm1190_vm0, %v2358_v38  ;;  %2307 = vmatmul.msk.bf16.gmra.mxu1 %vm1190_vm0, %v2374_v39 }
 0x142   : > { %v1823_v49 = vadd.f32 %v2834_v47, %v1787_v48  ;;  %2323 = vmatmul.msk.bf16.gmra.mxu2 %vm1190_vm0, %v2390_v44  ;;  %2339 = vmatmul.msk.bf16.gmra.mxu3 %vm1190_vm0, %v2406_v45 }
 0x144   : > { %v1855_v51 = vmax.f32 %v1823_v49, 0.0 }
 0x145   : > { %v1582_v52 = vpop.f32.mrf.mxu2  ;;  %v1662_v53 = vpop.f32.mrf.mxu3 }
 0x146   : > { %v2438_v54 = vpack.c.bf16 %v1855_v51, %v1854_v50  ;;  %v1424_v55 = vpop.f32.mrf.mxu0  ;;  %v1504_v56 = vpop.f32.mrf.mxu1  ;;  %v1756_v58 = vmax.f32 %v1582_v52, %v1662_v53 }
 0x147   : > { %v1725_v0 = vmax.f32 %v1424_v55, %v1504_v56 }
 0x148   : > { %2494 = vst [vmem:[%s2849_s14 + $0x28] sm:$0xff] %v2438_v54   ;;  %v1788_v59 = vmax.f32 %v1724_v57, %v1756_v58 }
 0x14a   : > { %v1824_v6 = vadd.f32 %v2834_v47, %v1788_v59 }
 0x14c   : > { %v1856_v9 = vmax.f32 %v1824_v6, 0.0 }
 0x14d   : > { %v1584_v60 = vpop.f32.mrf.mxu2  ;;  %v1664_v61 = vpop.f32.mrf.mxu3 }
 0x14e   : > { %v1757_v1 = vmax.f32 %v1584_v60, %v1664_v61  ;;  %v1427_v2 = vpop.f32.mrf.mxu0  ;;  %v1507_v3 = vpop.f32.mrf.mxu1 }
 0x14f   : > { %v1726_v16 = vmax.f32 %v1427_v2, %v1507_v3 }
 0x150   : > { %v1789_v7 = vmax.f32 %v1725_v0, %v1757_v1 }
 0x151   : > { %2292 = vmatmul.msk.bf16.gmra.mxu0 %vm1190_vm0, %v2359_v62  ;;  %2308 = vmatmul.msk.bf16.gmra.mxu1 %vm1190_vm0, %v2375_v63 }
 0x152   : > { %v1825_v8 = vadd.f32 %v2834_v47, %v1789_v7  ;;  %2324 = vmatmul.msk.bf16.gmra.mxu2 %vm1190_vm0, %v2391_v4  ;;  %2340 = vmatmul.msk.bf16.gmra.mxu3 %vm1190_vm0, %v2407_v5 }
 0x154   : > { %v1857_v10 = vmax.f32 %v1825_v8, 0.0 }
 0x155   : > { %v1587_v11 = vpop.f32.mrf.mxu2  ;;  %v1667_v12 = vpop.f32.mrf.mxu3 }
 0x156   : > { %v2443_v13 = vpack.c.bf16 %v1857_v10, %v1856_v9  ;;  %v1429_v14 = vpop.f32.mrf.mxu0  ;;  %v1509_v15 = vpop.f32.mrf.mxu1  ;;  %v1758_v17 = vmax.f32 %v1587_v11, %v1667_v12 }
 0x157   : > { %v1727_v21 = vmax.f32 %v1429_v14, %v1509_v15 }
 0x158   : > { %2495 = vst [vmem:[%s2849_s14 + $0x30] sm:$0xff] %v2443_v13   ;;  %v1790_v18 = vmax.f32 %v1726_v16, %v1758_v17 }
 0x15a   : > { %v1826_v25 = vadd.f32 %v2834_v47, %v1790_v18 }
 0x15c   : > { %v1858_v28 = vmax.f32 %v1826_v25, 0.0 }
 0x15d   : > { %v1589_v19 = vpop.f32.mrf.mxu2  ;;  %v1669_v20 = vpop.f32.mrf.mxu3 }
 0x15e   : > { %v1759_v22 = vmax.f32 %v1589_v19, %v1669_v20  ;;  %v1432_v23 = vpop.f32.mrf.mxu0  ;;  %v1512_v24 = vpop.f32.mrf.mxu1 }
 0x15f   : > { %v1728_v35 = vmax.f32 %v1432_v23, %v1512_v24 }
 0x160   : > { %v1791_v26 = vmax.f32 %v1727_v21, %v1759_v22 }
 0x162   : > { %v1827_v27 = vadd.f32 %v2834_v47, %v1791_v26 }
 0x164   : > { %v1859_v29 = vmax.f32 %v1827_v27, 0.0 }
 0x165   : > { %v1592_v30 = vpop.f32.mrf.mxu2  ;;  %v1672_v31 = vpop.f32.mrf.mxu3 }
 0x166   : > { %v2448_v32 = vpack.c.bf16 %v1859_v29, %v1858_v28  ;;  %v1434_v33 = vpop.f32.mrf.mxu0  ;;  %v1514_v34 = vpop.f32.mrf.mxu1  ;;  %v1760_v36 = vmax.f32 %v1592_v30, %v1672_v31 }
 0x167   : > { %v1729_v40 = vmax.f32 %v1434_v33, %v1514_v34 }
 0x168   : > { %2496 = vst [vmem:[%s2849_s14 + $0x38] sm:$0xff] %v2448_v32   ;;  %v1792_v37 = vmax.f32 %v1728_v35, %v1760_v36 }
 0x16a   : > { %v1828_v44 = vadd.f32 %v2834_v47, %v1792_v37 }
 0x16c   : > { %v1860_v48 = vmax.f32 %v1828_v44, 0.0 }
 0x16d   : > { %v1594_v38 = vpop.f32.mrf.mxu2  ;;  %v1674_v39 = vpop.f32.mrf.mxu3 }
 0x16e   : > { %v1761_v41 = vmax.f32 %v1594_v38, %v1674_v39  ;;  %v1437_v42 = vpop.f32.mrf.mxu0  ;;  %v1517_v43 = vpop.f32.mrf.mxu1 }
 0x16f   : > { %v1730_v55 = vmax.f32 %v1437_v42, %v1517_v43 }
 0x170   : > { %v1793_v45 = vmax.f32 %v1729_v40, %v1761_v41 }
 0x172   : > { %v1829_v46 = vadd.f32 %v2834_v47, %v1793_v45 }
 0x174   : > { %v1861_v49 = vmax.f32 %v1829_v46, 0.0 }
 0x175   : > { %v1597_v50 = vpop.f32.mrf.mxu2  ;;  %v1677_v51 = vpop.f32.mrf.mxu3 }
 0x176   : > { %v2453_v52 = vpack.c.bf16 %v1861_v49, %v1860_v48  ;;  %v1439_v53 = vpop.f32.mrf.mxu0  ;;  %v1519_v54 = vpop.f32.mrf.mxu1  ;;  %v1762_v56 = vmax.f32 %v1597_v50, %v1677_v51 }
 0x177   : > { %v1731_v60 = vmax.f32 %v1439_v53, %v1519_v54 }
 0x178   : > { %2497 = vst [vmem:[%s2849_s14 + $0x40] sm:$0xff] %v2453_v52   ;;  %v1794_v57 = vmax.f32 %v1730_v55, %v1762_v56 }
 0x17a   : > { %v1830_v0 = vadd.f32 %v2834_v47, %v1794_v57 }
 0x17c   : > { %v1862_v3 = vmax.f32 %v1830_v0, 0.0 }
 0x17d   : > { %v1599_v58 = vpop.f32.mrf.mxu2  ;;  %v1679_v59 = vpop.f32.mrf.mxu3 }
 0x17e   : > { %v1763_v61 = vmax.f32 %v1599_v58, %v1679_v59  ;;  %v1442_v62 = vpop.f32.mrf.mxu0  ;;  %v1522_v63 = vpop.f32.mrf.mxu1 }
 0x17f   : > { %v1732_v10 = vmax.f32 %v1442_v62, %v1522_v63 }
 0x180   : > { %v1795_v1 = vmax.f32 %v1731_v60, %v1763_v61 }
 0x182   : > { %v1831_v2 = vadd.f32 %v2834_v47, %v1795_v1 }
 0x184   : > { %v1863_v4 = vmax.f32 %v1831_v2, 0.0 }
 0x185   : > { %v1602_v5 = vpop.f32.mrf.mxu2  ;;  %v1682_v6 = vpop.f32.mrf.mxu3 }
 0x186   : > { %v2458_v7 = vpack.c.bf16 %v1863_v4, %v1862_v3  ;;  %v1444_v8 = vpop.f32.mrf.mxu0  ;;  %v1524_v9 = vpop.f32.mrf.mxu1  ;;  %v1764_v11 = vmax.f32 %v1602_v5, %v1682_v6 }
 0x187   : > { %v1733_v15 = vmax.f32 %v1444_v8, %v1524_v9 }
 0x188   : > { %2498 = vst [vmem:[%s2849_s14 + $0x48] sm:$0xff] %v2458_v7   ;;  %v1796_v12 = vmax.f32 %v1732_v10, %v1764_v11 }
 0x18a   : > { %v1832_v19 = vadd.f32 %v2834_v47, %v1796_v12 }
 0x18c   : > { %v1864_v22 = vmax.f32 %v1832_v19, 0.0 }
 0x18d   : > { %v1604_v13 = vpop.f32.mrf.mxu2  ;;  %v1684_v14 = vpop.f32.mrf.mxu3 }
 0x18e   : > { %v1765_v16 = vmax.f32 %v1604_v13, %v1684_v14  ;;  %v1447_v17 = vpop.f32.mrf.mxu0  ;;  %v1527_v18 = vpop.f32.mrf.mxu1 }
 0x18f   : > { %v1734_v29 = vmax.f32 %v1447_v17, %v1527_v18 }
 0x190   : > { %v1797_v20 = vmax.f32 %v1733_v15, %v1765_v16 }
 0x192   : > { %v1833_v21 = vadd.f32 %v2834_v47, %v1797_v20 }
 0x194   : > { %v1865_v23 = vmax.f32 %v1833_v21, 0.0 }
 0x195   : > { %v1607_v24 = vpop.f32.mrf.mxu2  ;;  %v1687_v25 = vpop.f32.mrf.mxu3 }
 0x196   : > { %v2463_v26 = vpack.c.bf16 %v1865_v23, %v1864_v22  ;;  %v1449_v27 = vpop.f32.mrf.mxu0  ;;  %v1529_v28 = vpop.f32.mrf.mxu1  ;;  %v1766_v30 = vmax.f32 %v1607_v24, %v1687_v25 }
 0x197   : > { %v1735_v34 = vmax.f32 %v1449_v27, %v1529_v28 }
 0x198   : > { %2499 = vst [vmem:[%s2849_s14 + $0x50] sm:$0xff] %v2463_v26   ;;  %v1798_v31 = vmax.f32 %v1734_v29, %v1766_v30 }
 0x19a   : > { %v1834_v38 = vadd.f32 %v2834_v47, %v1798_v31 }
 0x19c   : > { %v1866_v41 = vmax.f32 %v1834_v38, 0.0 }
 0x19d   : > { %v1609_v32 = vpop.f32.mrf.mxu2  ;;  %v1689_v33 = vpop.f32.mrf.mxu3 }
 0x19e   : > { %v1767_v35 = vmax.f32 %v1609_v32, %v1689_v33  ;;  %v1452_v36 = vpop.f32.mrf.mxu0  ;;  %v1532_v37 = vpop.f32.mrf.mxu1 }
 0x19f   : > { %v1736_v49 = vmax.f32 %v1452_v36, %v1532_v37 }
 0x1a0   : > { %v1799_v39 = vmax.f32 %v1735_v34, %v1767_v35 }
 0x1a2   : > { %v1835_v40 = vadd.f32 %v2834_v47, %v1799_v39 }
 0x1a4   : > { %v1867_v42 = vmax.f32 %v1835_v40, 0.0 }
 0x1a5   : > { %v1612_v43 = vpop.f32.mrf.mxu2  ;;  %v1692_v44 = vpop.f32.mrf.mxu3 }
 0x1a6   : > { %v2468_v45 = vpack.c.bf16 %v1867_v42, %v1866_v41  ;;  %v1454_v46 = vpop.f32.mrf.mxu0  ;;  %v1534_v48 = vpop.f32.mrf.mxu1  ;;  %v1768_v50 = vmax.f32 %v1612_v43, %v1692_v44 }
 0x1a7   : > { %v1737_v54 = vmax.f32 %v1454_v46, %v1534_v48 }
 0x1a8   : > { %2500 = vst [vmem:[%s2849_s14 + $0x58] sm:$0xff] %v2468_v45   ;;  %v1800_v51 = vmax.f32 %v1736_v49, %v1768_v50 }
 0x1aa   : > { %v1836_v58 = vadd.f32 %v2834_v47, %v1800_v51 }
 0x1ac   : > { %v1868_v61 = vmax.f32 %v1836_v58, 0.0 }
 0x1ad   : > { %v1614_v52 = vpop.f32.mrf.mxu2  ;;  %v1694_v53 = vpop.f32.mrf.mxu3 }
 0x1ae   : > { %v1769_v55 = vmax.f32 %v1614_v52, %v1694_v53  ;;  %v1457_v56 = vpop.f32.mrf.mxu0  ;;  %v1537_v57 = vpop.f32.mrf.mxu1 }
 0x1af   : > { %v1738_v4 = vmax.f32 %v1457_v56, %v1537_v57 }
 0x1b0   : > { %v1801_v59 = vmax.f32 %v1737_v54, %v1769_v55 }
 0x1b2   : > { %v1837_v60 = vadd.f32 %v2834_v47, %v1801_v59 }
 0x1b4   : > { %v1869_v62 = vmax.f32 %v1837_v60, 0.0 }
 0x1b5   : > { %v1617_v63 = vpop.f32.mrf.mxu2  ;;  %v1697_v0 = vpop.f32.mrf.mxu3 }
 0x1b6   : > { %v2473_v1 = vpack.c.bf16 %v1869_v62, %v1868_v61  ;;  %v1459_v2 = vpop.f32.mrf.mxu0  ;;  %v1539_v3 = vpop.f32.mrf.mxu1  ;;  %v1770_v5 = vmax.f32 %v1617_v63, %v1697_v0 }
 0x1b7   : > { %v1739_v9 = vmax.f32 %v1459_v2, %v1539_v3 }
 0x1b8   : > { %2501 = vst [vmem:[%s2849_s14 + $0x60] sm:$0xff] %v2473_v1   ;;  %v1802_v6 = vmax.f32 %v1738_v4, %v1770_v5 }
 0x1ba   : > { %v1838_v13 = vadd.f32 %v2834_v47, %v1802_v6 }
 0x1bc   : > { %v1870_v16 = vmax.f32 %v1838_v13, 0.0 }
 0x1bd   : > { %v1619_v7 = vpop.f32.mrf.mxu2  ;;  %v1699_v8 = vpop.f32.mrf.mxu3 }
 0x1be   : > { %v1771_v10 = vmax.f32 %v1619_v7, %v1699_v8  ;;  %v1462_v11 = vpop.f32.mrf.mxu0  ;;  %v1542_v12 = vpop.f32.mrf.mxu1 }
 0x1bf   : > { %v1740_v23 = vmax.f32 %v1462_v11, %v1542_v12 }
 0x1c0   : > { %v1803_v14 = vmax.f32 %v1739_v9, %v1771_v10 }
 0x1c2   : > { %v1839_v15 = vadd.f32 %v2834_v47, %v1803_v14 }
 0x1c4   : > { %v1871_v17 = vmax.f32 %v1839_v15, 0.0 }
 0x1c5   : > { %v1622_v18 = vpop.f32.mrf.mxu2  ;;  %v1702_v19 = vpop.f32.mrf.mxu3 }
 0x1c6   : > { %v2478_v20 = vpack.c.bf16 %v1871_v17, %v1870_v16  ;;  %v1464_v21 = vpop.f32.mrf.mxu0  ;;  %v1544_v22 = vpop.f32.mrf.mxu1  ;;  %v1772_v24 = vmax.f32 %v1622_v18, %v1702_v19 }
 0x1c7   : > { %v1741_v28 = vmax.f32 %v1464_v21, %v1544_v22 }
 0x1c8   : > { %2502 = vst [vmem:[%s2849_s14 + $0x68] sm:$0xff] %v2478_v20   ;;  %v1804_v25 = vmax.f32 %v1740_v23, %v1772_v24 }
 0x1ca   : > { %v1840_v30 = vadd.f32 %v2834_v47, %v1804_v25 }
 0x1cc   : > { %v1872_v35 = vmax.f32 %v1840_v30, 0.0 }
 0x1cd   : > { %v1624_v26 = vpop.f32.mrf.mxu2  ;;  %v1704_v27 = vpop.f32.mrf.mxu3 }
 0x1ce   : > { %v1773_v29 = vmax.f32 %v1624_v26, %v1704_v27  ;;  %v1467_v32 = vpop.f32.mrf.mxu0  ;;  %v1547_v33 = vpop.f32.mrf.mxu1 }
 0x1cf   : > { %v1742_v40 = vmax.f32 %v1467_v32, %v1547_v33 }
 0x1d0   : > { %v1805_v31 = vmax.f32 %v1741_v28, %v1773_v29 }
 0x1d2   : > { %v1841_v34 = vadd.f32 %v2834_v47, %v1805_v31 }
 0x1d4   : > { %v1873_v36 = vmax.f32 %v1841_v34, 0.0 }
 0x1d5   : > { %v1627_v37 = vpop.f32.mrf.mxu2  ;;  %v1707_v38 = vpop.f32.mrf.mxu3 }
 0x1d6   : > { %v2483_v39 = vpack.c.bf16 %v1873_v36, %v1872_v35  ;;  %v1774_v41 = vmax.f32 %v1627_v37, %v1707_v38  ;;  %v1469_v42 = vpop.f32.mrf.mxu0  ;;  %v1549_v43 = vpop.f32.mrf.mxu1 }
 0x1d7   : > { %v1743_v48 = vmax.f32 %v1469_v42, %v1549_v43 }
 0x1d8   : > { %2503 = vst [vmem:[%s2849_s14 + $0x70] sm:$0xff] %v2483_v39   ;;  %v1806_v44 = vmax.f32 %v1742_v40, %v1774_v41 }
 0x1da   : > { %v1842_v50 = vadd.f32 %v2834_v47, %v1806_v44 }
 0x1dc   : > { %v1874_v53 = vmax.f32 %v1842_v50, 0.0 }
 0x1dd   : > { %v1629_v45 = vpop.f32.mrf.mxu2  ;;  %v1709_v46 = vpop.f32.mrf.mxu3 }
 0x1de   : > { %v1775_v49 = vmax.f32 %v1629_v45, %v1709_v46 }
 0x1e0   : > { %v1807_v51 = vmax.f32 %v1743_v48, %v1775_v49 }
 0x1e2   : > { %v1843_v52 = vadd.f32 %v2834_v47, %v1807_v51 }
 0x1e4   : > { %v1875_v54 = vmax.f32 %v1843_v52, 0.0 }
 0x1e6   : > { %v2488_v55 = vpack.c.bf16 %v1875_v54, %v1874_v53 }
 0x1e8   : > { %2504 = vst [vmem:[%s2849_s14 + $0x78] sm:$0xff] %v2488_v55  }
 0x1e9 PF: > { %p10_p9 = scmp.ge.s32.totalorder %s2597_s16, 4   ;;  %s2959_s12 = smov %s2554_s13 }
 0x1ea   : > { %s2960_s13 = smov %s2606_s19  ;;  %s2961_s14 = smov %s2597_s16 }
 0x1eb   :  { %12 = sbr.rel (!%p10_p9) target bundleno = 2 (0x2), region = 108 }

// kernel: _lambda_.4
= control target key start
LH: loop header
LB: loop body
LE: loop exit
PB: predicated region body
PF: predicated region fallthrough
CT: control target
= control target key end

     0   :  { %s1012_s12 = smov 0   ;;  %s1014_s13 = smov 0   ;;  %s1153_s0 = inlined_call_operand.vmem [shape: bf16[4,128,96], index: 0, kind: input, shape index: {}]   ;;  %s1154_s1 = inlined_call_operand.vmem [shape: bf16[96,128], index: 1, kind: input, shape index: {}]   ;;  %s1155_s2 = inlined_call_operand.vmem [shape: f32[1,128], index: 2, kind: input, shape index: {}]   ;;  %s1156_s3 = inlined_call_operand.vmem [shape: bf16[128,128], index: 3, kind: output, shape index: {}]  }
   0x1   :  { %s1016_s14 = smov 0  }
   0x2 LB: > { %s762_s15 = sadd.s32 4294967295, %s990_s14   ;;  %s1029_s16 = sadd.s32 1, %s990_s14   ;;  %s990_s14 = sphi %s1016_s14, %s1159_s14   ;;  %s986_s13 = sphi %s1014_s13, %s1158_s13   ;;  %s982_s12 = sphi %s1012_s12, %s1157_s12  }
   0x3   : > { %s17_s17 = ssub.s32 %s990_s14, %s1029_s16  ;;  %s20_s18 = sadd.s32 1, %s986_s13 }
   0x4   : > { %p18_p0 = scmp.eq.s32.totalorder %s17_s17, 0  ;;  %p27_p1 = scmp.ne.s32.totalorder %s986_s13, %s982_s12 }
   0x5   : > { %p28_p2 = scmp.eq.s32.totalorder %s990_s14, 0  ;;  %p765_p4 = scmp.ge.s32.totalorder %s990_s14, 2 }
   0x6   : > { %s1038_s19 = scalar_select %p18_p0, %s986_s13, %s20_s18  }
   0x7   : > { %p29_p3 = por %p28_p2, %p27_p1  ;;  %127 = sbr.rel (%p765_p4) target bundleno = 32 (0x20), region = 24 }
   0xc   : > { %130 = sbr.rel (!%p29_p3) target bundleno = 32 (0x20), region = 28  ;;  %s132_s20 = sand.u32 (%p29_p3), 1, %s986_s13  }
   0xd   : > { %s879_s21 = sshll.u32 (%p29_p3), %s990_s14, 5  ;;  %s766_s22 = sshll.u32 (%p29_p3), %s132_s20, 7 }
   0xe   : > { %s1046_s25 = scalar_lea.vmem (%p29_p3), %s1153_s0, %s879_s21  ;;  %s134_s26 = scalar_lea.vmem (%p29_p3), [#allocation2], %s766_s22 }
   0xf   : > { %v154_v0 = vld [vmem:[%s1046_s25] sm:$0xff] (%p29_p3)   ;;  %v158_v1 = vld [vmem:[%s1046_s25 + $0x8] sm:$0xff] (%p29_p3)   ;;  %v162_v2 = vld [vmem:[%s1046_s25 + $0x10] sm:$0xff] (%p29_p3)  }
  0x10   : > { %155 = vst [vmem:[%s134_s26] sm:$0xff] (%p29_p3), %v154_v0   ;;  %v166_v3 = vld [vmem:[%s1046_s25 + $0x18] sm:$0xff] (%p29_p3)   ;;  %v170_v4 = vld [vmem:[%s1046_s25 + $0x40] sm:$0xff] (%p29_p3)   ;;  %v174_v5 = vld [vmem:[%s1046_s25 + $0x48] sm:$0xff] (%p29_p3)  }
  0x11   : > { %159 = vst [vmem:[%s134_s26 + $0x8] sm:$0xff] %v158_v1   ;;  %v178_v6 = vld [vmem:[%s1046_s25 + $0x50] sm:$0xff]   ;;  %v182_v7 = vld [vmem:[%s1046_s25 + $0x58] sm:$0xff]   ;;  %v186_v8 = vld [vmem:[%s1046_s25 + $0x80] sm:$0xff]  }
  0x12   : > { %163 = vst [vmem:[%s134_s26 + $0x10] sm:$0xff] %v162_v2   ;;  %v190_v9 = vld [vmem:[%s1046_s25 + $0x88] sm:$0xff]   ;;  %v194_v10 = vld [vmem:[%s1046_s25 + $0x90] sm:$0xff]   ;;  %v198_v11 = vld [vmem:[%s1046_s25 + $0x98] sm:$0xff]  }
  0x13   : > { %167 = vst [vmem:[%s134_s26 + $0x18] sm:$0xff] %v166_v3   ;;  %v202_v12 = vld [vmem:[%s1046_s25 + $0xc0] sm:$0xff]   ;;  %v206_v13 = vld [vmem:[%s1046_s25 + $0xc8] sm:$0xff]   ;;  %v210_v14 = vld [vmem:[%s1046_s25 + $0xd0] sm:$0xff]  }
  0x14   : > { %171 = vst [vmem:[%s134_s26 + $0x20] sm:$0xff] %v170_v4   ;;  %v214_v15 = vld [vmem:[%s1046_s25 + $0xd8] sm:$0xff]  }
  0x15   : > { %175 = vst [vmem:[%s134_s26 + $0x28] sm:$0xff] %v174_v5  }
  0x16   : > { %179 = vst [vmem:[%s134_s26 + $0x30] sm:$0xff] %v178_v6  }
  0x17   : > { %183 = vst [vmem:[%s134_s26 + $0x38] sm:$0xff] %v182_v7  }
  0x18   : > { %187 = vst [vmem:[%s134_s26 + $0x40] sm:$0xff] %v186_v8  }
  0x19   : > { %191 = vst [vmem:[%s134_s26 + $0x48] sm:$0xff] %v190_v9  }
  0x1a   : > { %195 = vst [vmem:[%s134_s26 + $0x50] sm:$0xff] %v194_v10  }
  0x1b   : > { %199 = vst [vmem:[%s134_s26 + $0x58] sm:$0xff] %v198_v11  }
  0x1c   : > { %203 = vst [vmem:[%s134_s26 + $0x60] sm:$0xff] %v202_v12  }
  0x1d   : > { %207 = vst [vmem:[%s134_s26 + $0x68] sm:$0xff] %v206_v13  }
  0x1e   : > { %211 = vst [vmem:[%s134_s26 + $0x70] sm:$0xff] %v210_v14  }
  0x1f   : > { %215 = vst [vmem:[%s134_s26 + $0x78] sm:$0xff] %v214_v15  }
  0x20 PF: > { %p769_p5 = scmp.ge.s32.totalorder %s990_s14, 1  ;;  %p304_p6 = scmp.lt.s32.totalorder %s990_s14, 3 }
  0x22   : > { %p305_p7 = pnand %p769_p5, %p304_p6 }
  0x23   : > { %s311_s8 = sand.u32 (!%p305_p7), 1, %s982_s12   ;;  %s771_s12 = sshll.u32 (!%p305_p7), %s762_s15, 3 }
  0x24   : > { %308 = sbr.rel (%p305_p7) target bundleno = 265 (0x109), region = 69  ;;  %s770_s11 = sshll.u32 (!%p305_p7), %s311_s8, 7 }
  0x25   : > { %s1085_s20 = scalar_lea.vmem (!%p305_p7), [#allocation2], %s770_s11  ;;  %p336_p8 = scmp.lt.s32.totalorder (!%p305_p7), %s771_s12, 15 }
  0x29   : > { %v901_v16 = vld [vmem:[%s1154_s1 + $0x28] sm:$0xff]  ;;  %v900_v17 = vld [vmem:[%s1154_s1 + $0x20] sm:$0xff]  ;;  %v899_v18 = vld [vmem:[%s1154_s1 + $0x18] sm:$0xff]  ;;  %vm502_vm0 = vcmask 785408   ;;  %s1161_s12 = smov (!%p336_p8, %s771_s12), 15 }
  0x2a   : > { %553 = vmatpush.bf16.msra.mxu0 %v901_v16  ;;  %925 = vmatpush.bf16.msra.mxu1 %v901_v16  ;;  %v898_v19 = vld [vmem:[%s1154_s1 + $0x10] sm:$0xff]  ;;  %v897_v20 = vld [vmem:[%s1154_s1 + $0x8] sm:$0xff]  ;;  %v896_v21 = vld [vmem:[%s1154_s1] sm:$0xff]  ;;  %s772_s14 = sshll.u32 %s1161_s12, 2 }
  0x2b   : > { %926 = vmatpush.bf16.msra.mxu2 %v901_v16  ;;  %927 = vmatpush.bf16.msra.mxu3 %v901_v16  ;;  %v880_v22 = vld [vmem:[%s1085_s20] sm:$0xff]  ;;  %v881_v26 = vld [vmem:[%s1085_s20 + $0x8] sm:$0xff]  ;;  %v882_v30 = vld [vmem:[%s1085_s20 + $0x10] sm:$0xff]  ;;  %s1131_s24 = scalar_lea.vmem %s1156_s3, %s772_s14 }
  0x2c   : > { %v884_v23 = vld [vmem:[%s1085_s20 + $0x20] sm:$0xff]  ;;  %v885_v27 = vld [vmem:[%s1085_s20 + $0x28] sm:$0xff]  ;;  %v886_v31 = vld [vmem:[%s1085_s20 + $0x30] sm:$0xff] }
  0x2d   : > { %v888_v24 = vld [vmem:[%s1085_s20 + $0x40] sm:$0xff]  ;;  %v889_v28 = vld [vmem:[%s1085_s20 + $0x48] sm:$0xff]  ;;  %v890_v32 = vld [vmem:[%s1085_s20 + $0x50] sm:$0xff] }
  0x2e   : > { %554 = vmatpush.bf16.msra.mxu0 %v900_v17  ;;  %928 = vmatpush.bf16.msra.mxu1 %v900_v17  ;;  %v892_v25 = vld [vmem:[%s1085_s20 + $0x60] sm:$0xff]  ;;  %v893_v29 = vld [vmem:[%s1085_s20 + $0x68] sm:$0xff]  ;;  %v894_v33 = vld [vmem:[%s1085_s20 + $0x70] sm:$0xff] }
  0x2f   : > { %929 = vmatpush.bf16.msra.mxu2 %v900_v17  ;;  %930 = vmatpush.bf16.msra.mxu3 %v900_v17  ;;  %v883_v34 = vld [vmem:[%s1085_s20 + $0x18] sm:$0xff]  ;;  %v1124_v47 = vld [vmem:[%s1155_s2] ss:$0 sm:$0xff] }
  0x30   : > { %v887_v35 = vld [vmem:[%s1085_s20 + $0x38] sm:$0xff] }
  0x31   : > { %v891_v36 = vld [vmem:[%s1085_s20 + $0x58] sm:$0xff] }
  0x32   : > { %555 = vmatpush.bf16.msra.mxu0 %v899_v18  ;;  %931 = vmatpush.bf16.msra.mxu1 %v899_v18  ;;  %v895_v37 = vld [vmem:[%s1085_s20 + $0x78] sm:$0xff] }
  0x33   : > { %932 = vmatpush.bf16.msra.mxu2 %v899_v18  ;;  %933 = vmatpush.bf16.msra.mxu3 %v899_v18 }
  0x36   : > { %556 = vmatpush.bf16.msra.mxu0 %v898_v19  ;;  %934 = vmatpush.bf16.msra.mxu1 %v898_v19 }
  0x37   : > { %935 = vmatpush.bf16.msra.mxu2 %v898_v19  ;;  %936 = vmatpush.bf16.msra.mxu3 %v898_v19 }
  0x3a   : > { %557 = vmatpush.bf16.msra.mxu0 %v897_v20  ;;  %937 = vmatpush.bf16.msra.mxu1 %v897_v20 }
  0x3b   : > { %938 = vmatpush.bf16.msra.mxu2 %v897_v20  ;;  %939 = vmatpush.bf16.msra.mxu3 %v897_v20 }
  0x3e   : > { %558 = vmatpush.bf16.msra.mxu0 %v896_v21  ;;  %940 = vmatpush.bf16.msra.mxu1 %v896_v21 }
  0x3f   : > { %941 = vmatpush.bf16.msra.mxu2 %v896_v21  ;;  %942 = vmatpush.bf16.msra.mxu3 %v896_v21 }
  0x41   : > { %861 = vmatmul.msk.bf16.vlgmr.msra.gmra.mxu0 %vm502_vm0, %v880_v22  ;;  %865 = vmatmul.msk.bf16.vlgmr.msra.gmra.mxu1 %vm502_vm0, %v884_v23 }
  0x42   : > { %869 = vmatmul.msk.bf16.vlgmr.msra.gmra.mxu2 %vm502_vm0, %v888_v24  ;;  %873 = vmatmul.msk.bf16.vlgmr.msra.gmra.mxu3 %vm502_vm0, %v892_v25 }
  0x51   : > { %862 = vmatmul.msk.bf16.gmra.mxu0 %vm502_vm0, %v881_v26  ;;  %866 = vmatmul.msk.bf16.gmra.mxu1 %vm502_vm0, %v885_v27 }
  0x52   : > { %870 = vmatmul.msk.bf16.gmra.mxu2 %vm502_vm0, %v889_v28  ;;  %874 = vmatmul.msk.bf16.gmra.mxu3 %vm502_vm0, %v893_v29 }
  0x61   : > { %863 = vmatmul.msk.bf16.gmra.mxu0 %vm502_vm0, %v882_v30  ;;  %867 = vmatmul.msk.bf16.gmra.mxu1 %vm502_vm0, %v886_v31 }
  0x62   : > { %871 = vmatmul.msk.bf16.gmra.mxu2 %vm502_vm0, %v890_v32  ;;  %875 = vmatmul.msk.bf16.gmra.mxu3 %vm502_vm0, %v894_v33 }
  0x71   : > { %864 = vmatmul.msk.bf16.gmra.mxu0 %vm502_vm0, %v883_v34  ;;  %868 = vmatmul.msk.bf16.gmra.mxu1 %vm502_vm0, %v887_v35 }
  0x72   : > { %872 = vmatmul.msk.bf16.gmra.mxu2 %vm502_vm0, %v891_v36  ;;  %876 = vmatmul.msk.bf16.gmra.mxu3 %vm502_vm0, %v895_v37 }
  0xbe   : > { %v560_v38 = vpop.f32.mrf.mxu0  ;;  %v580_v39 = vpop.f32.mrf.mxu1 }
  0xbf   : > { %v640_v44 = vmax.f32 %v560_v38, %v580_v39 }
  0xc5   : > { %v600_v40 = vpop.f32.mrf.mxu2  ;;  %v620_v41 = vpop.f32.mrf.mxu3 }
  0xc6   : > { %v562_v42 = vpop.f32.mrf.mxu0  ;;  %v582_v43 = vpop.f32.mrf.mxu1  ;;  %v648_v45 = vmax.f32 %v600_v40, %v620_v41 }
  0xc7   : > { %v641_v50 = vmax.f32 %v562_v42, %v582_v43 }
  0xc8   : > { %v656_v46 = vmax.f32 %v640_v44, %v648_v45 }
  0xca   : > { %v668_v54 = vadd.f32 %v1124_v47, %v656_v46 }
  0xcc   : > { %v676_v57 = vmax.f32 %v668_v54, 0.0 }
  0xcd   : > { %v602_v48 = vpop.f32.mrf.mxu2  ;;  %v622_v49 = vpop.f32.mrf.mxu3 }
  0xce   : > { %v649_v51 = vmax.f32 %v602_v48, %v622_v49  ;;  %v565_v52 = vpop.f32.mrf.mxu0  ;;  %v585_v53 = vpop.f32.mrf.mxu1 }
  0xcf   : > { %v642_v0 = vmax.f32 %v565_v52, %v585_v53 }
  0xd0   : > { %v657_v55 = vmax.f32 %v641_v50, %v649_v51 }
  0xd2   : > { %v669_v56 = vadd.f32 %v1124_v47, %v657_v55 }
  0xd4   : > { %v677_v58 = vmax.f32 %v669_v56, 0.0 }
  0xd5   : > { %v605_v59 = vpop.f32.mrf.mxu2  ;;  %v625_v60 = vpop.f32.mrf.mxu3 }
  0xd6   : > { %v905_v61 = vpack.c.bf16 %v677_v58, %v676_v57  ;;  %v567_v62 = vpop.f32.mrf.mxu0  ;;  %v587_v63 = vpop.f32.mrf.mxu1  ;;  %v650_v1 = vmax.f32 %v605_v59, %v625_v60 }
  0xd7   : > { %v643_v5 = vmax.f32 %v567_v62, %v587_v63 }
  0xd8   : > { %906 = vst [vmem:[%s1131_s24] sm:$0xff] %v905_v61   ;;  %v658_v2 = vmax.f32 %v642_v0, %v650_v1 }
  0xda   : > { %v670_v9 = vadd.f32 %v1124_v47, %v658_v2 }
  0xdc   : > { %v678_v12 = vmax.f32 %v670_v9, 0.0 }
  0xdd   : > { %v607_v3 = vpop.f32.mrf.mxu2  ;;  %v627_v4 = vpop.f32.mrf.mxu3 }
  0xde   : > { %v651_v6 = vmax.f32 %v607_v3, %v627_v4  ;;  %v570_v7 = vpop.f32.mrf.mxu0  ;;  %v590_v8 = vpop.f32.mrf.mxu1 }
  0xdf   : > { %v644_v19 = vmax.f32 %v570_v7, %v590_v8 }
  0xe0   : > { %v659_v10 = vmax.f32 %v643_v5, %v651_v6 }
  0xe2   : > { %v671_v11 = vadd.f32 %v1124_v47, %v659_v10 }
  0xe4   : > { %v679_v13 = vmax.f32 %v671_v11, 0.0 }
  0xe5   : > { %v610_v14 = vpop.f32.mrf.mxu2  ;;  %v630_v15 = vpop.f32.mrf.mxu3 }
  0xe6   : > { %v910_v16 = vpack.c.bf16 %v679_v13, %v678_v12  ;;  %v572_v17 = vpop.f32.mrf.mxu0  ;;  %v592_v18 = vpop.f32.mrf.mxu1  ;;  %v652_v20 = vmax.f32 %v610_v14, %v630_v15 }
  0xe7   : > { %v645_v24 = vmax.f32 %v572_v17, %v592_v18 }
  0xe8   : > { %922 = vst [vmem:[%s1131_s24 + $0x8] sm:$0xff] %v910_v16   ;;  %v660_v21 = vmax.f32 %v644_v19, %v652_v20 }
  0xea   : > { %v672_v26 = vadd.f32 %v1124_v47, %v660_v21 }
  0xec   : > { %v680_v31 = vmax.f32 %v672_v26, 0.0 }
  0xed   : > { %v612_v22 = vpop.f32.mrf.mxu2  ;;  %v632_v23 = vpop.f32.mrf.mxu3 }
  0xee   : > { %v653_v25 = vmax.f32 %v612_v22, %v632_v23  ;;  %v575_v28 = vpop.f32.mrf.mxu0  ;;  %v595_v29 = vpop.f32.mrf.mxu1 }
  0xef   : > { %v646_v36 = vmax.f32 %v575_v28, %v595_v29 }
  0xf0   : > { %v661_v27 = vmax.f32 %v645_v24, %v653_v25 }
  0xf2   : > { %v673_v30 = vadd.f32 %v1124_v47, %v661_v27 }
  0xf4   : > { %v681_v32 = vmax.f32 %v673_v30, 0.0 }
  0xf5   : > { %v615_v33 = vpop.f32.mrf.mxu2  ;;  %v635_v34 = vpop.f32.mrf.mxu3 }
  0xf6   : > { %v915_v35 = vpack.c.bf16 %v681_v32, %v680_v31  ;;  %v654_v37 = vmax.f32 %v615_v33, %v635_v34  ;;  %v577_v38 = vpop.f32.mrf.mxu0  ;;  %v597_v39 = vpop.f32.mrf.mxu1 }
  0xf7   : > { %v647_v43 = vmax.f32 %v577_v38, %v597_v39 }
  0xf8   : > { %923 = vst [vmem:[%s1131_s24 + $0x10] sm:$0xff] %v915_v35   ;;  %v662_v40 = vmax.f32 %v646_v36, %v654_v37 }
  0xfa   : > { %v674_v45 = vadd.f32 %v1124_v47, %v662_v40 }
  0xfc   : > { %v682_v49 = vmax.f32 %v674_v45, 0.0 }
  0xfd   : > { %v617_v41 = vpop.f32.mrf.mxu2  ;;  %v637_v42 = vpop.f32.mrf.mxu3 }
  0xfe   : > { %v655_v44 = vmax.f32 %v617_v41, %v637_v42 }
 0x100   : > { %v663_v46 = vmax.f32 %v647_v43, %v655_v44 }
 0x102   : > { %v675_v48 = vadd.f32 %v1124_v47, %v663_v46 }
 0x104   : > { %v683_v50 = vmax.f32 %v675_v48, 0.0 }
 0x106   : > { %v920_v51 = vpack.c.bf16 %v683_v50, %v682_v49 }
 0x108   : > { %924 = vst [vmem:[%s1131_s24 + $0x18] sm:$0xff] %v920_v51  }
 0x109 PF: > { %p10_p9 = scmp.ge.s32.totalorder %s1029_s16, 4   ;;  %s1157_s12 = smov %s986_s13 }
 0x10a   : > { %s1158_s13 = smov %s1038_s19  ;;  %s1159_s14 = smov %s1029_s16 }
 0x10b   :  { %12 = sbr.rel (!%p10_p9) target bundleno = 2 (0x2), region = 108 }

// kernel: _lambda_.5
= control target key start
LH: loop header
LB: loop body
LE: loop exit
PB: predicated region body
PF: predicated region fallthrough
CT: control target
= control target key end

     0   :  { %s4004_s1 = inlined_call_operand.vmem [shape: bf16[128,128], index: 1, kind: input, shape index: {}]   ;;  %s4005_s0 = inlined_call_operand.vmem [shape: bf16[4,128,128], index: 0, kind: input, shape index: {}]   ;;  %s4006_s2 = inlined_call_operand.vmem [shape: f32[1,128], index: 2, kind: input, shape index: {}]   ;;  %s4007_s3 = inlined_call_operand.vmem [shape: bf16[16,128,128], index: 3, kind: input, shape index: {}]   ;;  %s4008_s4 = inlined_call_operand.vmem [shape: f32[1,128], index: 4, kind: input, shape index: {}]   ;;  %s4009_s6 = inlined_call_operand.vmem [shape: f32[1,128], index: 6, kind: input, shape index: {}]   ;;  %s4010_s5 = inlined_call_operand.vmem [shape: bf16[128,128], index: 5, kind: input, shape index: {}]   ;;  %s4011_s7 = inlined_call_operand.vmem [shape: bf16[128,128], index: 7, kind: input, shape index: {}]   ;;  %s4012_s8 = inlined_call_operand.vmem [shape: f32[1,128], index: 8, kind: input, shape index: {}]   ;;  %s4013_s9 = inlined_call_operand.vmem [shape: f32[8,128], index: 9, kind: output, shape index: {}]  }
   0x1   :  { %v3073_v0 = vld [vmem:[%s4004_s1 + $0x38] sm:$0xff]  ;;  %v3072_v1 = vld [vmem:[%s4004_s1 + $0x30] sm:$0xff]  ;;  %v3071_v2 = vld [vmem:[%s4004_s1 + $0x28] sm:$0xff] }
   0x2   :  { %352 = vmatpush.bf16.msra.mxu0 %v3073_v0  ;;  %3219 = vmatpush.bf16.msra.mxu2 %v3073_v0  ;;  %v3070_v3 = vld [vmem:[%s4004_s1 + $0x20] sm:$0xff]  ;;  %v3069_v4 = vld [vmem:[%s4004_s1 + $0x18] sm:$0xff]  ;;  %v3068_v5 = vld [vmem:[%s4004_s1 + $0x10] sm:$0xff] }
   0x3   :  { %3218 = vmatpush.bf16.msra.mxu1 %v3073_v0  ;;  %3220 = vmatpush.bf16.msra.mxu3 %v3073_v0  ;;  %v3067_v6 = vld [vmem:[%s4004_s1 + $0x8] sm:$0xff]  ;;  %v3066_v7 = vld [vmem:[%s4004_s1] sm:$0xff]  ;;  %v3036_v10 = vld [vmem:[%s4005_s0 + $0x10] sm:$0xff] }
   0x4   :  { %v3034_v8 = vld [vmem:[%s4005_s0] sm:$0xff]  ;;  %v3035_v9 = vld [vmem:[%s4005_s0 + $0x8] sm:$0xff]  ;;  %v3037_v11 = vld [vmem:[%s4005_s0 + $0x18] sm:$0xff] }
   0x5   :  { %v3038_v12 = vld [vmem:[%s4005_s0 + $0x20] sm:$0xff]  ;;  %v3057_v13 = vld [vmem:[%s4005_s0 + $0xb8] sm:$0xff]  ;;  %v3039_v14 = vld [vmem:[%s4005_s0 + $0x28] sm:$0xff] }
   0x6   :  { %353 = vmatpush.bf16.msra.mxu0 %v3072_v1  ;;  %3222 = vmatpush.bf16.msra.mxu2 %v3072_v1  ;;  %v3058_v15 = vld [vmem:[%s4005_s0 + $0xc0] sm:$0xff]  ;;  %v3040_v16 = vld [vmem:[%s4005_s0 + $0x30] sm:$0xff]  ;;  %v3059_v17 = vld [vmem:[%s4005_s0 + $0xc8] sm:$0xff] }
   0x7   :  { %3221 = vmatpush.bf16.msra.mxu1 %v3072_v1  ;;  %3223 = vmatpush.bf16.msra.mxu3 %v3072_v1  ;;  %v3041_v18 = vld [vmem:[%s4005_s0 + $0x38] sm:$0xff]  ;;  %v3051_v19 = vld [vmem:[%s4005_s0 + $0x88] sm:$0xff]  ;;  %v3060_v20 = vld [vmem:[%s4005_s0 + $0xd0] sm:$0xff] }
   0x8   :  { %v3042_v21 = vld [vmem:[%s4005_s0 + $0x40] sm:$0xff]  ;;  %v3052_v23 = vld [vmem:[%s4005_s0 + $0x90] sm:$0xff]  ;;  %v3061_v25 = vld [vmem:[%s4005_s0 + $0xd8] sm:$0xff] }
   0x9   :  { %v3043_v26 = vld [vmem:[%s4005_s0 + $0x48] sm:$0xff]  ;;  %v3053_v28 = vld [vmem:[%s4005_s0 + $0x98] sm:$0xff]  ;;  %v3062_v30 = vld [vmem:[%s4005_s0 + $0xe0] sm:$0xff] }
   0xa   :  { %354 = vmatpush.bf16.msra.mxu0 %v3071_v2  ;;  %3225 = vmatpush.bf16.msra.mxu2 %v3071_v2  ;;  %v3044_v31 = vld [vmem:[%s4005_s0 + $0x50] sm:$0xff]  ;;  %v3054_v33 = vld [vmem:[%s4005_s0 + $0xa0] sm:$0xff]  ;;  %v3063_v34 = vld [vmem:[%s4005_s0 + $0xe8] sm:$0xff] }
   0xb   :  { %3224 = vmatpush.bf16.msra.mxu1 %v3071_v2  ;;  %3226 = vmatpush.bf16.msra.mxu3 %v3071_v2  ;;  %v3045_v36 = vld [vmem:[%s4005_s0 + $0x58] sm:$0xff]  ;;  %v3055_v38 = vld [vmem:[%s4005_s0 + $0xa8] sm:$0xff]  ;;  %v3064_v39 = vld [vmem:[%s4005_s0 + $0xf0] sm:$0xff] }
   0xc   :  { %v3046_v41 = vld [vmem:[%s4005_s0 + $0x60] sm:$0xff]  ;;  %v3056_v43 = vld [vmem:[%s4005_s0 + $0xb0] sm:$0xff]  ;;  %v3065_v44 = vld [vmem:[%s4005_s0 + $0xf8] sm:$0xff] }
   0xd   :  { %v3097_v45 = vld [vmem:[%s4007_s3 + $0xb8] sm:$0xff]  ;;  %v3096_v47 = vld [vmem:[%s4007_s3 + $0xb0] sm:$0xff]  ;;  %v3095_v48 = vld [vmem:[%s4007_s3 + $0xa8] sm:$0xff] }
   0xe   :  { %355 = vmatpush.bf16.msra.mxu0 %v3070_v3  ;;  %3228 = vmatpush.bf16.msra.mxu2 %v3070_v3  ;;  %v3047_v49 = vld [vmem:[%s4005_s0 + $0x68] sm:$0xff]  ;;  %v3094_v52 = vld [vmem:[%s4007_s3 + $0xa0] sm:$0xff]  ;;  %v3093_v53 = vld [vmem:[%s4007_s3 + $0x98] sm:$0xff] }
   0xf   :  { %3227 = vmatpush.bf16.msra.mxu1 %v3070_v3  ;;  %3229 = vmatpush.bf16.msra.mxu3 %v3070_v3  ;;  %v3092_v56 = vld [vmem:[%s4007_s3 + $0x90] sm:$0xff]  ;;  %v3091_v57 = vld [vmem:[%s4007_s3 + $0x88] sm:$0xff]  ;;  %v3090_v61 = vld [vmem:[%s4007_s3 + $0x80] sm:$0xff] }
  0x10   :  { %v3048_v58 = vld [vmem:[%s4005_s0 + $0x70] sm:$0xff]  ;;  %v3121_v62 = vld [vmem:[%s4007_s3 + $0x178] sm:$0xff]  ;;  %v3119_v2 = vld [vmem:[%s4007_s3 + $0x168] sm:$0xff] }
  0x11   :  { %v3120_v63 = vld [vmem:[%s4007_s3 + $0x170] sm:$0xff]  ;;  %v3049_v3 = vld [vmem:[%s4005_s0 + $0x78] sm:$0xff] }
  0x12   :  { %356 = vmatpush.bf16.msra.mxu0 %v3069_v4  ;;  %3231 = vmatpush.bf16.msra.mxu2 %v3069_v4 }
  0x13   :  { %3230 = vmatpush.bf16.msra.mxu1 %v3069_v4  ;;  %3232 = vmatpush.bf16.msra.mxu3 %v3069_v4  ;;  %v3118_v4 = vld [vmem:[%s4007_s3 + $0x160] sm:$0xff] }
  0x16   :  { %357 = vmatpush.bf16.msra.mxu0 %v3068_v5  ;;  %3234 = vmatpush.bf16.msra.mxu2 %v3068_v5 }
  0x17   :  { %3233 = vmatpush.bf16.msra.mxu1 %v3068_v5  ;;  %3235 = vmatpush.bf16.msra.mxu3 %v3068_v5 }
  0x1a   :  { %358 = vmatpush.bf16.msra.mxu0 %v3067_v6  ;;  %3237 = vmatpush.bf16.msra.mxu2 %v3067_v6 }
  0x1b   :  { %3236 = vmatpush.bf16.msra.mxu1 %v3067_v6  ;;  %3238 = vmatpush.bf16.msra.mxu3 %v3067_v6 }
  0x1e   :  { %359 = vmatpush.bf16.msra.mxu0 %v3066_v7  ;;  %3240 = vmatpush.bf16.msra.mxu2 %v3066_v7 }
  0x1f   :  { %3239 = vmatpush.bf16.msra.mxu1 %v3066_v7  ;;  %3241 = vmatpush.bf16.msra.mxu3 %v3066_v7 }
  0x21   :  { %360 = vmatmul.bf16.vlgmr.msra.gmra.mxu0 %v3034_v8  ;;  %475 = vmatmul.bf16.vlgmr.msra.gmra.mxu2 %v3057_v13  ;;  %v3117_v8 = vld [vmem:[%s4007_s3 + $0x158] sm:$0xff] }
  0x22   :  { %445 = vmatmul.bf16.vlgmr.msra.gmra.mxu1 %v3051_v19  ;;  %505 = vmatmul.bf16.vlgmr.msra.gmra.mxu3 %v3063_v34 }
  0x23   :  { %828 = vmatpush.bf16.msrb.mxu3 %v3097_v45 }
  0x27   :  { %829 = vmatpush.bf16.msrb.mxu3 %v3096_v47 }
  0x2b   :  { %830 = vmatpush.bf16.msrb.mxu3 %v3095_v48 }
  0x2f   :  { %831 = vmatpush.bf16.msrb.mxu3 %v3094_v52 }
  0x31   :  { %365 = vmatmul.bf16.gmra.mxu0 %v3035_v9  ;;  %480 = vmatmul.bf16.gmra.mxu2 %v3058_v15  ;;  %v3116_v9 = vld [vmem:[%s4007_s3 + $0x150] sm:$0xff]  ;;  %v3050_v15 = vld [vmem:[%s4005_s0 + $0x80] sm:$0xff] }
  0x32   :  { %450 = vmatmul.bf16.gmra.mxu1 %v3052_v23  ;;  %510 = vmatmul.bf16.gmra.mxu3 %v3064_v39 }
  0x33   :  { %832 = vmatpush.bf16.msrb.mxu3 %v3093_v53  ;;  %v3144_v53 = vld [vmem:[%s4007_s3 + $0x230] sm:$0xff] }
  0x37   :  { %833 = vmatpush.bf16.msrb.mxu3 %v3092_v56 }
  0x3b   :  { %834 = vmatpush.bf16.msrb.mxu3 %v3091_v57  ;;  %v3143_v57 = vld [vmem:[%s4007_s3 + $0x228] sm:$0xff] }
  0x3f   :  { %835 = vmatpush.bf16.msrb.mxu3 %v3090_v61 }
  0x41   :  { %370 = vmatmul.bf16.gmra.mxu0 %v3036_v10  ;;  %485 = vmatmul.bf16.gmra.mxu2 %v3059_v17 }
  0x42   :  { %455 = vmatmul.bf16.gmra.mxu1 %v3053_v28  ;;  %515 = vmatmul.bf16.gmra.mxu3 %v3065_v44  ;;  %v3145_v44 = vld [vmem:[%s4007_s3 + $0x238] sm:$0xff] }
  0x43   :  { %1068 = vmatpush.bf16.msra.mxu3 %v3121_v62  ;;  %v3142_v62 = vld [vmem:[%s4007_s3 + $0x220] sm:$0xff] }
  0x47   :  { %1069 = vmatpush.bf16.msra.mxu3 %v3120_v63 }
  0x4b   :  { %1070 = vmatpush.bf16.msra.mxu3 %v3119_v2 }
  0x4f   :  { %1071 = vmatpush.bf16.msra.mxu3 %v3118_v4 }
  0x51   :  { %375 = vmatmul.bf16.gmra.mxu0 %v3037_v11  ;;  %490 = vmatmul.bf16.gmra.mxu2 %v3060_v20 }
  0x52   :  { %460 = vmatmul.bf16.gmra.mxu1 %v3054_v33  ;;  %v3512_v33 = vld [vmem:[%s4006_s2] ss:$0 sm:$0xff] }
  0x53   :  { %1072 = vmatpush.bf16.msra.mxu3 %v3117_v8 }
  0x57   :  { %1073 = vmatpush.bf16.msra.mxu3 %v3116_v9 }
  0x61   :  { %380 = vmatmul.bf16.gmra.mxu0 %v3038_v12  ;;  %495 = vmatmul.bf16.gmra.mxu2 %v3061_v25 }
  0x62   :  { %465 = vmatmul.bf16.gmra.mxu1 %v3055_v38 }
  0x71   :  { %385 = vmatmul.bf16.gmra.mxu0 %v3039_v14  ;;  %500 = vmatmul.bf16.gmra.mxu2 %v3062_v30  ;;  %v3115_v14 = vld [vmem:[%s4007_s3 + $0x148] sm:$0xff] }
  0x72   :  { %470 = vmatmul.bf16.gmra.mxu1 %v3056_v43  ;;  %1074 = vmatpush.bf16.msra.mxu3 %v3115_v14 }
  0x81   :  { %390 = vmatmul.bf16.gmra.mxu0 %v3040_v16  ;;  %v3114_v16 = vld [vmem:[%s4007_s3 + $0x140] sm:$0xff] }
  0x82   :  { %1075 = vmatpush.bf16.msra.mxu3 %v3114_v16 }
  0x91   :  { %395 = vmatmul.bf16.gmra.mxu0 %v3041_v18 }
  0x9e   :  { %v3362_v22 = vpop.f32.mrf.mxu0 }
  0x9f   :  { %v446_v6 = vpop.f32.mrf.mxu1 }
  0xa1   :  { %400 = vmatmul.bf16.gmra.mxu0 %v3042_v21 }
  0xa4   :  { %v3438_v51 = vpop.f32.mrf.mxu2 }
  0xa6   :  { %v3367_v24 = vpop.f32.mrf.mxu0 }
  0xa7   :  { %v448_v11 = vpop.f32.mrf.mxu1 }
  0xac   :  { %v3448_v55 = vpop.f32.mrf.mxu2 }
  0xae   :  { %v3375_v27 = vpop.f32.mrf.mxu0 }
  0xaf   :  { %v451_v18 = vpop.f32.mrf.mxu1 }
  0xb1   :  { %405 = vmatmul.bf16.gmra.mxu0 %v3043_v26 }
  0xb4   :  { %v3461_v60 = vpop.f32.mrf.mxu2 }
  0xb6   :  { %v3380_v29 = vpop.f32.mrf.mxu0 }
  0xb7   :  { %v453_v23 = vpop.f32.mrf.mxu1 }
  0xbc   :  { %v3474_v1 = vpop.f32.mrf.mxu2 }
  0xbe   :  { %v3388_v32 = vpop.f32.mrf.mxu0 }
  0xbf   :  { %v456_v30 = vpop.f32.mrf.mxu1 }
  0xc1   :  { %410 = vmatmul.bf16.gmra.mxu0 %v3044_v31 }
  0xc4   :  { %v486_v7 = vpop.f32.mrf.mxu2 }
  0xc5   :  { %v539_v26 = vmax.f32 %v446_v6, %v486_v7 }
  0xc6   :  { %v3396_v35 = vpop.f32.mrf.mxu0 }
  0xc7   :  { %v458_v45 = vpop.f32.mrf.mxu1 }
  0xcc   :  { %v488_v12 = vpop.f32.mrf.mxu2 }
  0xcd   :  { %v540_v13 = vmax.f32 %v448_v11, %v488_v12  ;;  %v3543_v11 = vpop.f32.mrf.mxu3  ;;  %v3081_v12 = vld [vmem:[%s4007_s3 + $0x38] sm:$0xff] }
  0xce   :  { %v3401_v37 = vpop.f32.mrf.mxu0  ;;  %749 = vmatpush.bf16.msrb.mxu2 %v3081_v12 }
  0xd1   :  { %415 = vmatmul.bf16.gmra.mxu0 %v3045_v36 }
  0xd4   :  { %v491_v19 = vpop.f32.mrf.mxu2 }
  0xd5   :  { %v541_v20 = vmax.f32 %v451_v18, %v491_v19  ;;  %v508_v12 = vpop.f32.mrf.mxu3 }
  0xd6   :  { %v3409_v40 = vpop.f32.mrf.mxu0 }
  0xdc   :  { %v493_v25 = vpop.f32.mrf.mxu2 }
  0xdd   :  { %v542_v63 = vmax.f32 %v453_v23, %v493_v25  ;;  %v3138_v23 = vld [vmem:[%s4007_s3 + $0x200] sm:$0xff]  ;;  %v3089_v25 = vld [vmem:[%s4007_s3 + $0x78] sm:$0xff] }
  0xde   :  { %v3414_v42 = vpop.f32.mrf.mxu0  ;;  %688 = vmatpush.bf16.msrb.mxu1 %v3089_v25 }
  0xe1   :  { %420 = vmatmul.bf16.gmra.mxu0 %v3046_v41 }
  0xe4   :  { %v496_v34 = vpop.f32.mrf.mxu2 }
  0xe5   :  { %v543_v36 = vmax.f32 %v456_v30, %v496_v34 }
  0xe6   :  { %v3425_v46 = vpop.f32.mrf.mxu0 }
  0xec   :  { %v498_v48 = vpop.f32.mrf.mxu2 }
  0xee   :  { %v3436_v50 = vpop.f32.mrf.mxu0 }
  0xf1   :  { %425 = vmatmul.bf16.gmra.mxu0 %v3047_v49  ;;  %v544_v49 = vmax.f32 %v458_v45, %v498_v48 }
  0xf4   :  { %v501_v34 = vpop.f32.mrf.mxu2 }
  0xf6   :  { %v3446_v54 = vpop.f32.mrf.mxu0 }
  0xfe   :  { %v3459_v59 = vpop.f32.mrf.mxu0 }
 0x101   :  { %430 = vmatmul.bf16.gmra.mxu0 %v3048_v58  ;;  %v461_v58 = vpop.f32.mrf.mxu1 }
 0x106   :  { %v3472_v0 = vpop.f32.mrf.mxu0 }
 0x109   :  { %v3536_v4 = vpop.f32.mrf.mxu1 }
 0x10e   :  { %v3485_v5 = vpop.f32.mrf.mxu0 }
 0x111   :  { %435 = vmatmul.bf16.gmra.mxu0 %v3049_v3  ;;  %v3141_v3 = vld [vmem:[%s4007_s3 + $0x218] sm:$0xff]  ;;  %v3551_v14 = vpop.f32.mrf.mxu1 }
 0x112   :  { %v547_v18 = vmax.f32 %v3551_v14, %v3543_v11  ;;  %v3192_v11 = vld [vmem:[%s4007_s3 + $0x3b0] sm:$0xff] }
 0x116   :  { %v3493_v10 = vpop.f32.mrf.mxu0 }
 0x11e   :  { %v3504_v17 = vpop.f32.mrf.mxu0 }
 0x121   :  { %440 = vmatmul.bf16.gmra.mxu0 %v3050_v15 }
 0x126   :  { %v3506_v21 = vpop.f32.mrf.mxu0 }
 0x12e   :  { %v406_v28 = vpop.f32.mrf.mxu0 }
 0x12f   :  { %v523_v31 = vmax.f32 %v3375_v27, %v406_v28 }
 0x131   :  { %v555_v38 = vmax.f32 %v523_v31, %v539_v26  ;;  %v3079_v26 = vld [vmem:[%s4007_s3 + $0x28] sm:$0xff]  ;;  %v3168_v31 = vld [vmem:[%s4007_s3 + $0x2f0] sm:$0xff] }
 0x133   :  { %v575_v39 = vadd.f32 %v3512_v33, %v555_v38  ;;  %v3088_v38 = vld [vmem:[%s4007_s3 + $0x70] sm:$0xff] }
 0x134   :  { %689 = vmatpush.bf16.msrb.mxu1 %v3088_v38  ;;  %v511_v38 = vpop.f32.mrf.mxu3 }
 0x135   :  { %v591_v41 = vmax.f32 %v575_v39, 0.0  ;;  %v3078_v39 = vld [vmem:[%s4007_s3 + $0x20] sm:$0xff] }
 0x136   :  { %v408_v43 = vpop.f32.mrf.mxu0 }
 0x137   :  { %v524_v47 = vmax.f32 %v3380_v29, %v408_v43  ;;  %v762_v27 = vpack.c.bf16 %v591_v41, %v591_v41  ;;  %v545_v41 = vmax.f32 %v461_v58, %v501_v34  ;;  %v3087_v43 = vld [vmem:[%s4007_s3 + $0x68] sm:$0xff] }
 0x138   :  { %690 = vmatpush.bf16.msrb.mxu1 %v3087_v43  ;;  %v3103_v43 = vld [vmem:[%s4007_s3 + $0xe8] sm:$0xff] }
 0x139   :  { %v3519_v52 = vmax.f32 %v524_v47, %v540_v13  ;;  %836 = vmatmul.bf16.vlgmr.msrb.gmra.mxu3 %v762_v27  ;;  %v3166_v27 = vld [vmem:[%s4007_s3 + $0x2e0] sm:$0xff] }
 0x13a   :  { %1308 = vmatpush.bf16.msrb.mxu3 %v3145_v44  ;;  %v3077_v44 = vld [vmem:[%s4007_s3 + $0x18] sm:$0xff] }
 0x13e   :  { %v411_v56 = vpop.f32.mrf.mxu0  ;;  %1309 = vmatpush.bf16.msrb.mxu3 %v3144_v53  ;;  %v3076_v53 = vld [vmem:[%s4007_s3 + $0x10] sm:$0xff] }
 0x13f   :  { %v525_v29 = vmax.f32 %v3388_v32, %v411_v56  ;;  %v3140_v32 = vld [vmem:[%s4007_s3 + $0x210] sm:$0xff]  ;;  %v503_v56 = vpop.f32.mrf.mxu2 }
 0x141   :  { %v3528_v61 = vmax.f32 %v525_v29, %v541_v20  ;;  %v3080_v20 = vld [vmem:[%s4007_s3 + $0x30] sm:$0xff]  ;;  %v546_v29 = vmax.f32 %v3536_v4, %v503_v56 }
 0x142   :  { %1310 = vmatpush.bf16.msrb.mxu3 %v3143_v57  ;;  %750 = vmatpush.bf16.msrb.mxu2 %v3080_v20 }
 0x146   :  { %v413_v2 = vpop.f32.mrf.mxu0  ;;  %1311 = vmatpush.bf16.msrb.mxu3 %v3142_v62  ;;  %751 = vmatpush.bf16.msrb.mxu2 %v3079_v26  ;;  %v3085_v62 = vld [vmem:[%s4007_s3 + $0x58] sm:$0xff] }
 0x147   :  { %v526_v6 = vmax.f32 %v3396_v35, %v413_v2  ;;  %v3139_v35 = vld [vmem:[%s4007_s3 + $0x208] sm:$0xff]  ;;  %v3105_v26 = vld [vmem:[%s4007_s3 + $0xf8] sm:$0xff] }
 0x149   :  { %v558_v7 = vmax.f32 %v526_v6, %v542_v63  ;;  %v3075_v63 = vld [vmem:[%s4007_s3 + $0x8] sm:$0xff] }
 0x14a   :  { %1312 = vmatpush.bf16.msrb.mxu3 %v3141_v3  ;;  %752 = vmatpush.bf16.msrb.mxu2 %v3078_v39 }
 0x14b   :  { %v578_v8 = vadd.f32 %v3512_v33, %v558_v7  ;;  %v3164_v7 = vld [vmem:[%s4007_s3 + $0x2d0] sm:$0xff] }
 0x14d   :  { %v594_v9 = vmax.f32 %v578_v8, 0.0  ;;  %v3074_v8 = vld [vmem:[%s4007_s3] sm:$0xff] }
 0x14e   :  { %v416_v13 = vpop.f32.mrf.mxu0  ;;  %1313 = vmatpush.bf16.msrb.mxu3 %v3140_v32  ;;  %753 = vmatpush.bf16.msrb.mxu2 %v3077_v44  ;;  %v3084_v32 = vld [vmem:[%s4007_s3 + $0x50] sm:$0xff]  ;;  %v3109_v44 = vld [vmem:[%s4007_s3 + $0x118] sm:$0xff] }
 0x14f   :  { %v1002_v15 = vpack.c.bf16 %v594_v9, %v594_v9  ;;  %v527_v16 = vmax.f32 %v3401_v37, %v416_v13  ;;  %v3169_v37 = vld [vmem:[%s4007_s3 + $0x2f8] sm:$0xff]  ;;  %v3163_v9 = vld [vmem:[%s4007_s3 + $0x2c8] sm:$0xff] }
 0x150   :  { %v3083_v13 = vld [vmem:[%s4007_s3 + $0x48] sm:$0xff] }
 0x151   :  { %v3556_v19 = vmax.f32 %v527_v16, %v543_v36  ;;  %1076 = vmatmul.bf16.vlgmr.msra.gmra.mxu3 %v1002_v15  ;;  %v468_v15 = vpop.f32.mrf.mxu1  ;;  %v3112_v16 = vld [vmem:[%s4007_s3 + $0x130] sm:$0xff] }
 0x152   :  { %1314 = vmatpush.bf16.msrb.mxu3 %v3139_v35  ;;  %754 = vmatpush.bf16.msrb.mxu2 %v3076_v53  ;;  %v548_v14 = vmax.f32 %v468_v15, %v508_v12  ;;  %v3108_v53 = vld [vmem:[%s4007_s3 + $0x110] sm:$0xff]  ;;  %v3099_v12 = vld [vmem:[%s4007_s3 + $0xc8] sm:$0xff] }
 0x156   :  { %v418_v28 = vpop.f32.mrf.mxu0  ;;  %1315 = vmatpush.bf16.msrb.mxu3 %v3138_v23  ;;  %755 = vmatpush.bf16.msrb.mxu2 %v3075_v63  ;;  %v3162_v23 = vld [vmem:[%s4007_s3 + $0x2c0] sm:$0xff]  ;;  %v3101_v63 = vld [vmem:[%s4007_s3 + $0xd8] sm:$0xff] }
 0x157   :  { %v528_v30 = vmax.f32 %v3409_v40, %v418_v28  ;;  %v3167_v40 = vld [vmem:[%s4007_s3 + $0x2e8] sm:$0xff] }
 0x158   :  { %v3111_v28 = vld [vmem:[%s4007_s3 + $0x128] sm:$0xff] }
 0x159   :  { %v3577_v36 = vmax.f32 %v528_v30, %v544_v49  ;;  %v3086_v49 = vld [vmem:[%s4007_s3 + $0x60] sm:$0xff]  ;;  %v3104_v30 = vld [vmem:[%s4007_s3 + $0xf0] sm:$0xff]  ;;  %v471_v39 = vpop.f32.mrf.mxu1 }
 0x15a   :  { %1548 = vmatpush.bf16.msra.mxu3 %v3169_v37  ;;  %691 = vmatpush.bf16.msrb.mxu1 %v3086_v49  ;;  %v3193_v37 = vld [vmem:[%s4007_s3 + $0x3b8] sm:$0xff]  ;;  %v3102_v49 = vld [vmem:[%s4007_s3 + $0xe0] sm:$0xff] }
 0x15b   :  { %756 = vmatpush.bf16.msrb.mxu2 %v3074_v8 }
 0x15e   :  { %1549 = vmatpush.bf16.msra.mxu3 %v3168_v31  ;;  %v421_v45 = vpop.f32.mrf.mxu0  ;;  %692 = vmatpush.bf16.msrb.mxu1 %v3085_v62  ;;  %v3110_v31 = vld [vmem:[%s4007_s3 + $0x120] sm:$0xff] }
 0x15f   :  { %v529_v47 = vmax.f32 %v3414_v42, %v421_v45  ;;  %v3165_v42 = vld [vmem:[%s4007_s3 + $0x2d8] sm:$0xff]  ;;  %v3190_v45 = vld [vmem:[%s4007_s3 + $0x3a0] sm:$0xff] }
 0x161   :  { %v561_v48 = vmax.f32 %v529_v47, %v545_v41  ;;  %v473_v62 = vpop.f32.mrf.mxu1 }
 0x162   :  { %1550 = vmatpush.bf16.msra.mxu3 %v3167_v40  ;;  %693 = vmatpush.bf16.msrb.mxu1 %v3084_v32  ;;  %v3191_v40 = vld [vmem:[%s4007_s3 + $0x3a8] sm:$0xff]  ;;  %v3106_v32 = vld [vmem:[%s4007_s3 + $0x100] sm:$0xff] }
 0x163   :  { %v581_v57 = vadd.f32 %v3512_v33, %v561_v48 }
 0x165   :  { %v597_v58 = vmax.f32 %v581_v57, 0.0 }
 0x166   :  { %1551 = vmatpush.bf16.msra.mxu3 %v3166_v27  ;;  %v423_v2 = vpop.f32.mrf.mxu0  ;;  %694 = vmatpush.bf16.msrb.mxu1 %v3083_v13  ;;  %v549_v27 = vmax.f32 %v471_v39, %v511_v38  ;;  %v522_v38 = vmax.f32 %v3367_v24, %v3506_v21  ;;  %v3135_v24 = vld [vmem:[%s4007_s3 + $0x1e8] sm:$0xff] }
 0x167   :  { %v1242_v3 = vpack.c.bf16 %v597_v58, %v597_v58  ;;  %v530_v6 = vmax.f32 %v3425_v46, %v423_v2  ;;  %v3113_v46 = vld [vmem:[%s4007_s3 + $0x138] sm:$0xff]  ;;  %v3188_v2 = vld [vmem:[%s4007_s3 + $0x390] sm:$0xff] }
 0x168   :  { %988 = vmatpush.bf16.msra.mxu2 %v3113_v46  ;;  %v3187_v46 = vld [vmem:[%s4007_s3 + $0x388] sm:$0xff] }
 0x169   :  { %v3619_v4 = vmax.f32 %v530_v6, %v546_v29  ;;  %1316 = vmatmul.bf16.vlgmr.msrb.gmra.mxu3 %v1242_v3  ;;  %v513_v29 = vpop.f32.mrf.mxu3 }
 0x16a   :  { %1552 = vmatpush.bf16.msra.mxu3 %v3165_v42  ;;  %v3189_v42 = vld [vmem:[%s4007_s3 + $0x398] sm:$0xff]  ;;  %v550_v3 = vmax.f32 %v473_v62, %v513_v29  ;;  %v3131_v29 = vld [vmem:[%s4007_s3 + $0x1c8] sm:$0xff] }
 0x16c   :  { %989 = vmatpush.bf16.msra.mxu2 %v3112_v16  ;;  %v3098_v16 = vld [vmem:[%s4007_s3 + $0xc0] sm:$0xff] }
 0x16e   :  { %1553 = vmatpush.bf16.msra.mxu3 %v3164_v7  ;;  %v426_v35 = vpop.f32.mrf.mxu0  ;;  %v3100_v7 = vld [vmem:[%s4007_s3 + $0xd0] sm:$0xff] }
 0x16f   :  { %v531_v20 = vmax.f32 %v3436_v50, %v426_v35  ;;  %v3082_v50 = vld [vmem:[%s4007_s3 + $0x40] sm:$0xff] }
 0x170   :  { %695 = vmatpush.bf16.msrb.mxu1 %v3082_v50  ;;  %990 = vmatpush.bf16.msra.mxu2 %v3111_v28  ;;  %v3186_v35 = vld [vmem:[%s4007_s3 + $0x380] sm:$0xff] }
 0x171   :  { %v3649_v25 = vmax.f32 %v531_v20, %v547_v18  ;;  %v516_v13 = vpop.f32.mrf.mxu3 }
 0x172   :  { %1554 = vmatpush.bf16.msra.mxu3 %v3163_v9 }
 0x174   :  { %908 = vmatpush.bf16.msra.mxu1 %v3105_v26  ;;  %991 = vmatpush.bf16.msra.mxu2 %v3110_v31 }
 0x176   :  { %1555 = vmatpush.bf16.msra.mxu3 %v3162_v23  ;;  %v428_v18 = vpop.f32.mrf.mxu0 }
 0x177   :  { %v532_v34 = vmax.f32 %v3446_v54, %v428_v18 }
 0x178   :  { %909 = vmatpush.bf16.msra.mxu1 %v3104_v30  ;;  %992 = vmatpush.bf16.msra.mxu2 %v3109_v44  ;;  %v3128_v44 = vld [vmem:[%s4007_s3 + $0x1b0] sm:$0xff] }
 0x179   :  { %v564_v41 = vmax.f32 %v532_v34, %v548_v14  ;;  %v3137_v34 = vld [vmem:[%s4007_s3 + $0x1f8] sm:$0xff] }
 0x17a   :  { %1788 = vmatpush.bf16.msrb.mxu3 %v3193_v37 }
 0x17b   :  { %v584_v54 = vadd.f32 %v3512_v33, %v564_v41 }
 0x17c   :  { %910 = vmatpush.bf16.msra.mxu1 %v3103_v43  ;;  %993 = vmatpush.bf16.msra.mxu2 %v3108_v53  ;;  %v3129_v43 = vld [vmem:[%s4007_s3 + $0x1b8] sm:$0xff]  ;;  %v3126_v53 = vld [vmem:[%s4007_s3 + $0x1a0] sm:$0xff] }
 0x17d   :  { %v600_v47 = vmax.f32 %v584_v54, 0.0  ;;  %v3134_v54 = vld [vmem:[%s4007_s3 + $0x1e0] sm:$0xff] }
 0x17e   :  { %1789 = vmatpush.bf16.msrb.mxu3 %v3192_v11  ;;  %v431_v48 = vpop.f32.mrf.mxu0 }
 0x17f   :  { %v1482_v56 = vpack.c.bf16 %v600_v47, %v600_v47  ;;  %v533_v57 = vmax.f32 %v3459_v59, %v431_v48  ;;  %v3107_v59 = vld [vmem:[%s4007_s3 + $0x108] sm:$0xff]  ;;  %v3758_v47 = vpop.f32.mrf.mxu3  ;;  %v576_v48 = vadd.f32 %v3512_v33, %v3519_v52  ;;  %v3125_v52 = vld [vmem:[%s4007_s3 + $0x198] sm:$0xff] }
 0x180   :  { %911 = vmatpush.bf16.msra.mxu1 %v3102_v49  ;;  %994 = vmatpush.bf16.msra.mxu2 %v3107_v59  ;;  %v3124_v59 = vld [vmem:[%s4007_s3 + $0x190] sm:$0xff] }
 0x181   :  { %v3693_v58 = vmax.f32 %v533_v57, %v549_v27  ;;  %1556 = vmatmul.bf16.vlgmr.msra.gmra.mxu3 %v1482_v56  ;;  %v3133_v27 = vld [vmem:[%s4007_s3 + $0x1d8] sm:$0xff]  ;;  %v3132_v56 = vld [vmem:[%s4007_s3 + $0x1d0] sm:$0xff]  ;;  %v592_v57 = vmax.f32 %v576_v48, 0.0  ;;  %v3179_v48 = vld [vmem:[%s4007_s3 + $0x348] sm:$0xff] }
 0x182   :  { %1790 = vmatpush.bf16.msrb.mxu3 %v3191_v40 }
 0x183   :  { %v842_v62 = vpack.c.bf16 %v592_v57, %v592_v57 }
 0x184   :  { %912 = vmatpush.bf16.msra.mxu1 %v3101_v63  ;;  %995 = vmatpush.bf16.msra.mxu2 %v3106_v32  ;;  %v580_v63 = vadd.f32 %v3512_v33, %v3577_v36  ;;  %v3123_v36 = vld [vmem:[%s4007_s3 + $0x188] sm:$0xff]  ;;  %v579_v32 = vadd.f32 %v3512_v33, %v3556_v19 }
 0x185   :  { %v3159_v19 = vld [vmem:[%s4007_s3 + $0x2a8] sm:$0xff] }
 0x186   :  { %1791 = vmatpush.bf16.msrb.mxu3 %v3190_v45  ;;  %v433_v6 = vpop.f32.mrf.mxu0 }
 0x187   :  { %v534_v8 = vmax.f32 %v3472_v0, %v433_v6  ;;  %v551_v0 = vmax.f32 %v3438_v51, %v516_v13  ;;  %v521_v51 = vmax.f32 %v3362_v22, %v3504_v17  ;;  %v3136_v22 = vld [vmem:[%s4007_s3 + $0x1f0] sm:$0xff]  ;;  %v3161_v6 = vld [vmem:[%s4007_s3 + $0x2b8] sm:$0xff]  ;;  %v595_v13 = vmax.f32 %v579_v32, 0.0 }
 0x188   :  { %913 = vmatpush.bf16.msra.mxu1 %v3100_v7  ;;  %v3197_v32 = vld [vmem:[%s4007_s3 + $0x3d8] sm:$0xff] }
 0x189   :  { %v3714_v9 = vmax.f32 %v534_v8, %v550_v3  ;;  %v596_v3 = vmax.f32 %v580_v63, 0.0  ;;  %v3170_v63 = vld [vmem:[%s4007_s3 + $0x300] sm:$0xff] }
 0x18a   :  { %1792 = vmatpush.bf16.msrb.mxu3 %v3189_v42 }
 0x18b   :  { %v1162_v8 = vpack.c.bf16 %v596_v3, %v596_v3 }
 0x18c   :  { %914 = vmatpush.bf16.msra.mxu1 %v3099_v12  ;;  %v3122_v12 = vld [vmem:[%s4007_s3 + $0x180] sm:$0xff] }
 0x18e   :  { %1793 = vmatpush.bf16.msrb.mxu3 %v3188_v2  ;;  %v436_v15 = vpop.f32.mrf.mxu0  ;;  %v3130_v2 = vld [vmem:[%s4007_s3 + $0x1c0] sm:$0xff] }
 0x18f   :  { %v535_v20 = vmax.f32 %v3485_v5, %v436_v15  ;;  %v3152_v15 = vld [vmem:[%s4007_s3 + $0x270] sm:$0xff] }
 0x190   :  { %915 = vmatpush.bf16.msra.mxu1 %v3098_v16  ;;  %v3158_v16 = vld [vmem:[%s4007_s3 + $0x2a0] sm:$0xff] }
 0x191   :  { %v567_v23 = vmax.f32 %v535_v20, %v551_v0  ;;  %v1082_v0 = vpack.c.bf16 %v595_v13, %v595_v13  ;;  %v3151_v20 = vld [vmem:[%s4007_s3 + $0x268] sm:$0xff] }
 0x192   :  { %1794 = vmatpush.bf16.msrb.mxu3 %v3187_v46  ;;  %v3160_v46 = vld [vmem:[%s4007_s3 + $0x2b0] sm:$0xff] }
 0x193   :  { %v587_v37 = vadd.f32 %v3512_v33, %v567_v23  ;;  %v3157_v23 = vld [vmem:[%s4007_s3 + $0x298] sm:$0xff] }
 0x195   :  { %v603_v50 = vmax.f32 %v587_v37, 0.0 }
 0x196   :  { %1795 = vmatpush.bf16.msrb.mxu3 %v3186_v35  ;;  %v3728_v26 = vpop.f32.mrf.mxu0  ;;  %v3153_v35 = vld [vmem:[%s4007_s3 + $0x278] sm:$0xff] }
 0x197   :  { %v1722_v28 = vpack.c.bf16 %v603_v50, %v603_v50  ;;  %v3150_v50 = vld [vmem:[%s4007_s3 + $0x260] sm:$0xff] }
 0x199   :  { %1796 = vmatmul.bf16.vlgmr.msrb.gmra.mxu3 %v1722_v28  ;;  %v3156_v28 = vld [vmem:[%s4007_s3 + $0x290] sm:$0xff] }
 0x19e   :  { %v441_v11 = vpop.f32.mrf.mxu0 }
 0x19f   :  { %v537_v14 = vmax.f32 %v441_v11, %v3461_v60  ;;  %v3149_v11 = vld [vmem:[%s4007_s3 + $0x258] sm:$0xff] }
 0x1a1   :  { %v553_v18 = vmax.f32 %v521_v51, %v537_v14  ;;  %v3155_v51 = vld [vmem:[%s4007_s3 + $0x288] sm:$0xff]  ;;  %v583_v14 = vadd.f32 %v3512_v33, %v3649_v25 }
 0x1a2   :  { %v3147_v25 = vld [vmem:[%s4007_s3 + $0x248] sm:$0xff] }
 0x1a3   :  { %v573_v30 = vadd.f32 %v3512_v33, %v553_v18 }
 0x1a5   :  { %v589_v5 = vmax.f32 %v573_v30, 0.0  ;;  %v3148_v30 = vld [vmem:[%s4007_s3 + $0x250] sm:$0xff] }
 0x1a6   :  { %v443_v31 = vpop.f32.mrf.mxu0 }
 0x1a7   :  { %v538_v39 = vmax.f32 %v443_v31, %v3474_v1  ;;  %v605_v40 = vpack.c.bf16 %v589_v5, %v589_v5  ;;  %v577_v1 = vadd.f32 %v3512_v33, %v3528_v61  ;;  %v3127_v61 = vld [vmem:[%s4007_s3 + $0x1a8] sm:$0xff]  ;;  %v3154_v5 = vld [vmem:[%s4007_s3 + $0x280] sm:$0xff]  ;;  %v599_v31 = vmax.f32 %v583_v14, 0.0 }
 0x1a9   :  { %v554_v41 = vmax.f32 %v522_v38, %v538_v39  ;;  %757 = vmatmul.bf16.vlgmr.msrb.gmra.mxu2 %v605_v40  ;;  %v593_v45 = vmax.f32 %v577_v1, 0.0  ;;  %v582_v38 = vadd.f32 %v3512_v33, %v3619_v4  ;;  %v1402_v39 = vpack.c.bf16 %v599_v31, %v599_v31  ;;  %v3184_v40 = vld [vmem:[%s4007_s3 + $0x370] sm:$0xff]  ;;  %v3183_v4 = vld [vmem:[%s4007_s3 + $0x368] sm:$0xff]  ;;  %v3182_v1 = vld [vmem:[%s4007_s3 + $0x360] sm:$0xff] }
 0x1aa   :  { %1228 = vmatpush.bf16.msrb.mxu2 %v3137_v34  ;;  %v3185_v34 = vld [vmem:[%s4007_s3 + $0x378] sm:$0xff] }
 0x1ab   :  { %v574_v60 = vadd.f32 %v3512_v33, %v554_v41  ;;  %v922_v49 = vpack.c.bf16 %v593_v45, %v593_v45  ;;  %v3146_v41 = vld [vmem:[%s4007_s3 + $0x240] sm:$0xff] }
 0x1ac   :  { %v3174_v45 = vld [vmem:[%s4007_s3 + $0x320] sm:$0xff] }
 0x1ad   :  { %v590_v17 = vmax.f32 %v574_v60, 0.0  ;;  %v3177_v60 = vld [vmem:[%s4007_s3 + $0x338] sm:$0xff] }
 0x1ae   :  { %1229 = vmatpush.bf16.msrb.mxu2 %v3136_v22  ;;  %v598_v22 = vmax.f32 %v582_v38, 0.0 }
 0x1af   :  { %v622_v21 = vpack.c.bf16 %v590_v17, %v590_v17 }
 0x1b0   :  { %v1322_v17 = vpack.c.bf16 %v598_v22, %v598_v22 }
 0x1b1   :  { %696 = vmatmul.bf16.vlgmr.msrb.gmra.mxu1 %v622_v21  ;;  %v3175_v21 = vld [vmem:[%s4007_s3 + $0x328] sm:$0xff] }
 0x1b2   :  { %1148 = vmatpush.bf16.msrb.mxu1 %v3129_v43  ;;  %1230 = vmatpush.bf16.msrb.mxu2 %v3135_v24  ;;  %v3176_v24 = vld [vmem:[%s4007_s3 + $0x330] sm:$0xff] }
 0x1b6   :  { %1149 = vmatpush.bf16.msrb.mxu1 %v3128_v44  ;;  %1231 = vmatpush.bf16.msrb.mxu2 %v3134_v54  ;;  %v3181_v44 = vld [vmem:[%s4007_s3 + $0x358] sm:$0xff] }
 0x1b9   :  { %996 = vmatmul.bf16.vlgmr.msra.gmra.mxu2 %v922_v49  ;;  %v586_v49 = vadd.f32 %v3512_v33, %v3714_v9  ;;  %v585_v9 = vadd.f32 %v3512_v33, %v3693_v58  ;;  %v3200_v58 = vld [vmem:[%s4007_s3 + $0x3f0] sm:$0xff] }
 0x1ba   :  { %1150 = vmatpush.bf16.msrb.mxu1 %v3127_v61  ;;  %1232 = vmatpush.bf16.msrb.mxu2 %v3133_v27  ;;  %v3180_v61 = vld [vmem:[%s4007_s3 + $0x350] sm:$0xff]  ;;  %v3173_v27 = vld [vmem:[%s4007_s3 + $0x318] sm:$0xff] }
 0x1bb   :  { %v602_v57 = vmax.f32 %v586_v49, 0.0 }
 0x1bc   :  { %v3774_v42 = vpop.f32.mrf.mxu3 }
 0x1be   :  { %1151 = vmatpush.bf16.msrb.mxu1 %v3126_v53  ;;  %1233 = vmatpush.bf16.msrb.mxu2 %v3132_v56  ;;  %v3172_v53 = vld [vmem:[%s4007_s3 + $0x310] sm:$0xff]  ;;  %v3178_v56 = vld [vmem:[%s4007_s3 + $0x340] sm:$0xff] }
 0x1c1   :  { %916 = vmatmul.bf16.vlgmr.msra.gmra.mxu1 %v842_v62 }
 0x1c2   :  { %1152 = vmatpush.bf16.msrb.mxu1 %v3125_v52  ;;  %1234 = vmatpush.bf16.msrb.mxu2 %v3131_v29  ;;  %v3171_v52 = vld [vmem:[%s4007_s3 + $0x308] sm:$0xff]  ;;  %v1642_v29 = vpack.c.bf16 %v602_v57, %v602_v57 }
 0x1c4   :  { %v839_v7 = vpop.f32.mrf.mxu3 }
 0x1c5   :  { %v3199_v7 = vld [vmem:[%s4007_s3 + $0x3e8] sm:$0xff] }
 0x1c6   :  { %1153 = vmatpush.bf16.msrb.mxu1 %v3124_v59  ;;  %1235 = vmatpush.bf16.msrb.mxu2 %v3130_v2  ;;  %v601_v59 = vmax.f32 %v585_v9, 0.0  ;;  %v3201_v2 = vld [vmem:[%s4007_s3 + $0x3f8] sm:$0xff] }
 0x1c8   :  { %v1562_v3 = vpack.c.bf16 %v601_v59, %v601_v59  ;;  %v3213_v59 = vld [vmem:[%s4011_s7 + $0x18] sm:$0xff] }
 0x1c9   :  { %1236 = vmatmul.bf16.vlgmr.msrb.gmra.mxu2 %v1162_v8  ;;  %v536_v8 = vmax.f32 %v3493_v10, %v3728_v26 }
 0x1ca   :  { %1468 = vmatpush.bf16.msra.mxu2 %v3161_v6  ;;  %1154 = vmatpush.bf16.msrb.mxu1 %v3123_v36  ;;  %v3198_v36 = vld [vmem:[%s4007_s3 + $0x3e0] sm:$0xff] }
 0x1ce   :  { %1469 = vmatpush.bf16.msra.mxu2 %v3160_v46  ;;  %1155 = vmatpush.bf16.msrb.mxu1 %v3122_v12  ;;  %v552_v46 = vmax.f32 %v3448_v55, %v3758_v47  ;;  %v3196_v12 = vld [vmem:[%s4007_s3 + $0x3d0] sm:$0xff]  ;;  %v3194_v55 = vld [vmem:[%s4007_s3 + $0x3c0] sm:$0xff] }
 0x1d0   :  { %v568_v13 = vmax.f32 %v536_v8, %v552_v46 }
 0x1d1   :  { %1156 = vmatmul.bf16.vlgmr.msrb.gmra.mxu1 %v1082_v0 }
 0x1d2   :  { %1388 = vmatpush.bf16.msra.mxu1 %v3153_v35  ;;  %1470 = vmatpush.bf16.msra.mxu2 %v3159_v19  ;;  %v3195_v19 = vld [vmem:[%s4007_s3 + $0x3c8] sm:$0xff]  ;;  %v588_v0 = vadd.f32 %v3512_v33, %v568_v13  ;;  %v3210_v13 = vld [vmem:[%s4011_s7] sm:$0xff] }
 0x1d4   :  { %v3822_v37 = vpop.f32.mrf.mxu3  ;;  %v604_v10 = vmax.f32 %v588_v0, 0.0 }
 0x1d6   :  { %1389 = vmatpush.bf16.msra.mxu1 %v3152_v15  ;;  %1471 = vmatpush.bf16.msra.mxu2 %v3158_v16  ;;  %v1802_v47 = vpack.c.bf16 %v604_v10, %v604_v10 }
 0x1da   :  { %1390 = vmatpush.bf16.msra.mxu1 %v3151_v20  ;;  %1472 = vmatpush.bf16.msra.mxu2 %v3157_v23 }
 0x1dc   :  { %v1079_v18 = vpop.f32.mrf.mxu3 }
 0x1de   :  { %1391 = vmatpush.bf16.msra.mxu1 %v3150_v50  ;;  %1473 = vmatpush.bf16.msra.mxu2 %v3156_v28 }
 0x1e2   :  { %1392 = vmatpush.bf16.msra.mxu1 %v3149_v11  ;;  %1474 = vmatpush.bf16.msra.mxu2 %v3155_v51 }
 0x1e6   :  { %1393 = vmatpush.bf16.msra.mxu1 %v3148_v30  ;;  %1475 = vmatpush.bf16.msra.mxu2 %v3154_v5 }
 0x1e9   :  { %1476 = vmatmul.bf16.vlgmr.msra.gmra.mxu2 %v1402_v39 }
 0x1ea   :  { %1708 = vmatpush.bf16.msrb.mxu2 %v3185_v34  ;;  %1394 = vmatpush.bf16.msra.mxu1 %v3147_v25 }
 0x1ec   :  { %v3864_v43 = vpop.f32.mrf.mxu3 }
 0x1ee   :  { %1709 = vmatpush.bf16.msrb.mxu2 %v3184_v40  ;;  %1395 = vmatpush.bf16.msra.mxu1 %v3146_v41 }
 0x1f1   :  { %1396 = vmatmul.bf16.vlgmr.msra.gmra.mxu1 %v1322_v17 }
 0x1f2   :  { %1628 = vmatpush.bf16.msrb.mxu1 %v3177_v60  ;;  %1710 = vmatpush.bf16.msrb.mxu2 %v3183_v4  ;;  %v3209_v60 = vld [vmem:[%s4010_s5 + $0x38] sm:$0xff] }
 0x1f4   :  { %v1319_v54 = vpop.f32.mrf.mxu3 }
 0x1f6   :  { %1629 = vmatpush.bf16.msrb.mxu1 %v3176_v24  ;;  %1711 = vmatpush.bf16.msrb.mxu2 %v3182_v1  ;;  %v3206_v24 = vld [vmem:[%s4010_s5 + $0x20] sm:$0xff]  ;;  %v3205_v1 = vld [vmem:[%s4010_s5 + $0x18] sm:$0xff] }
 0x1fa   :  { %1630 = vmatpush.bf16.msrb.mxu1 %v3175_v21  ;;  %1712 = vmatpush.bf16.msrb.mxu2 %v3181_v44  ;;  %v3204_v21 = vld [vmem:[%s4010_s5 + $0x10] sm:$0xff]  ;;  %v3203_v44 = vld [vmem:[%s4010_s5 + $0x8] sm:$0xff] }
 0x1fe   :  { %1631 = vmatpush.bf16.msrb.mxu1 %v3174_v45  ;;  %1713 = vmatpush.bf16.msrb.mxu2 %v3180_v61  ;;  %v3202_v61 = vld [vmem:[%s4010_s5] sm:$0xff] }
 0x202   :  { %1632 = vmatpush.bf16.msrb.mxu1 %v3173_v27  ;;  %1714 = vmatpush.bf16.msrb.mxu2 %v3179_v48  ;;  %v3217_v48 = vld [vmem:[%s4011_s7 + $0x38] sm:$0xff] }
 0x203   :  { %2040 = vmatpush.bf16.msra.mxu3 %v3217_v48 }
 0x204   :  { %v3903_v62 = vpop.f32.mrf.mxu3 }
 0x206   :  { %1633 = vmatpush.bf16.msrb.mxu1 %v3172_v53  ;;  %1715 = vmatpush.bf16.msrb.mxu2 %v3178_v56  ;;  %v3216_v56 = vld [vmem:[%s4011_s7 + $0x30] sm:$0xff] }
 0x207   :  { %2041 = vmatpush.bf16.msra.mxu3 %v3216_v56 }
 0x209   :  { %1716 = vmatmul.bf16.vlgmr.msrb.gmra.mxu2 %v1642_v29  ;;  %v3214_v29 = vld [vmem:[%s4011_s7 + $0x20] sm:$0xff] }
 0x20a   :  { %1634 = vmatpush.bf16.msrb.mxu1 %v3171_v52  ;;  %1957 = vmatpush.bf16.msra.mxu2 %v3209_v60  ;;  %v3215_v52 = vld [vmem:[%s4011_s7 + $0x28] sm:$0xff] }
 0x20b   :  { %2042 = vmatpush.bf16.msra.mxu3 %v3215_v52 }
 0x20c   :  { %v1559_v6 = vpop.f32.mrf.mxu3 }
 0x20d   :  { %v3243_v6 = vld [vmem:[%s4008_s4] ss:$0 sm:$0xff] }
 0x20e   :  { %1635 = vmatpush.bf16.msrb.mxu1 %v3170_v63 }
 0x20f   :  { %2043 = vmatpush.bf16.msra.mxu3 %v3214_v29 }
 0x211   :  { %1636 = vmatmul.bf16.vlgmr.msrb.gmra.mxu1 %v1562_v3  ;;  %v3212_v3 = vld [vmem:[%s4011_s7 + $0x10] sm:$0xff] }
 0x212   :  { %1868 = vmatpush.bf16.msra.mxu1 %v3201_v2 }
 0x213   :  { %2044 = vmatpush.bf16.msra.mxu3 %v3213_v59 }
 0x216   :  { %1869 = vmatpush.bf16.msra.mxu1 %v3200_v58 }
 0x217   :  { %2045 = vmatpush.bf16.msra.mxu3 %v3212_v3 }
 0x21a   :  { %1870 = vmatpush.bf16.msra.mxu1 %v3199_v7 }
 0x21c   :  { %v3930_v35 = vpop.f32.mrf.mxu3 }
 0x21e   :  { %1871 = vmatpush.bf16.msra.mxu1 %v3198_v36 }
 0x222   :  { %1872 = vmatpush.bf16.msra.mxu1 %v3197_v32 }
 0x224   :  { %v1799_v26 = vpop.f32.mrf.mxu3 }
 0x226   :  { %1873 = vmatpush.bf16.msra.mxu1 %v3196_v12  ;;  %v3211_v12 = vld [vmem:[%s4011_s7 + $0x8] sm:$0xff] }
 0x227   :  { %2046 = vmatpush.bf16.msra.mxu3 %v3211_v12 }
 0x22a   :  { %1874 = vmatpush.bf16.msra.mxu1 %v3195_v19 }
 0x22b   :  { %2047 = vmatpush.bf16.msra.mxu3 %v3210_v13 }
 0x22c   :  { %v758_v15 = vpop.f32.mrf.mxu2 }
 0x22e   :  { %1875 = vmatpush.bf16.msra.mxu1 %v3194_v55  ;;  %v697_v16 = vpop.f32.mrf.mxu1 }
 0x22f   :  { %v759_v20 = vadd.f32 %v758_v15, %v697_v16 }
 0x231   :  { %1876 = vmatmul.bf16.vlgmr.msra.gmra.mxu1 %v1802_v47  ;;  %v841_v11 = vadd.f32 %v3774_v42, %v759_v20  ;;  %v3208_v42 = vld [vmem:[%s4010_s5 + $0x30] sm:$0xff]  ;;  %v3245_v47 = vld [vmem:[%s4012_s8] ss:$0 sm:$0xff] }
 0x232   :  { %1958 = vmatpush.bf16.msra.mxu2 %v3208_v42 }
 0x234   :  { %v760_v23 = vpop.f32.mrf.mxu2 }
 0x236   :  { %v699_v50 = vpop.f32.mrf.mxu1 }
 0x23c   :  { %v997_v28 = vpop.f32.mrf.mxu2 }
 0x23e   :  { %v917_v51 = vpop.f32.mrf.mxu1 }
 0x23f   :  { %v921_v33 = vadd.f32 %v917_v51, %v841_v11 }
 0x241   :  { %v1001_v14 = vadd.f32 %v997_v28, %v921_v33 }
 0x243   :  { %v1081_v31 = vadd.f32 %v3822_v37, %v1001_v14  ;;  %v3207_v37 = vld [vmem:[%s4010_s5 + $0x28] sm:$0xff] }
 0x244   :  { %v999_v18 = vpop.f32.mrf.mxu2  ;;  %1959 = vmatpush.bf16.msra.mxu2 %v3207_v37 }
 0x246   :  { %v919_v30 = vpop.f32.mrf.mxu1 }
 0x248   :  { %1960 = vmatpush.bf16.msra.mxu2 %v3206_v24 }
 0x24c   :  { %v1237_v5 = vpop.f32.mrf.mxu2  ;;  %1961 = vmatpush.bf16.msra.mxu2 %v3205_v1 }
 0x24e   :  { %v1157_v34 = vpop.f32.mrf.mxu1 }
 0x24f   :  { %v1161_v25 = vadd.f32 %v1157_v34, %v1081_v31 }
 0x250   :  { %1962 = vmatpush.bf16.msra.mxu2 %v3204_v21 }
 0x251   :  { %v1241_v38 = vadd.f32 %v1237_v5, %v1161_v25 }
 0x253   :  { %v1321_v49 = vadd.f32 %v3864_v43, %v1241_v38 }
 0x254   :  { %v1239_v39 = vpop.f32.mrf.mxu2  ;;  %1963 = vmatpush.bf16.msra.mxu2 %v3203_v44 }
 0x256   :  { %v1159_v40 = vpop.f32.mrf.mxu1 }
 0x258   :  { %1964 = vmatpush.bf16.msra.mxu2 %v3202_v61 }
 0x26c   :  { %v1477_v41 = vpop.f32.mrf.mxu2 }
 0x26e   :  { %v1397_v22 = vpop.f32.mrf.mxu1 }
 0x26f   :  { %v1401_v57 = vadd.f32 %v1397_v22, %v1321_v49 }
 0x271   :  { %v1481_v9 = vadd.f32 %v1477_v41, %v1401_v57 }
 0x273   :  { %v1561_v43 = vadd.f32 %v3903_v62, %v1481_v9 }
 0x274   :  { %v1479_v4 = vpop.f32.mrf.mxu2 }
 0x276   :  { %v1399_v17 = vpop.f32.mrf.mxu1 }
 0x28c   :  { %v1717_v54 = vpop.f32.mrf.mxu2 }
 0x28e   :  { %v1637_v45 = vpop.f32.mrf.mxu1 }
 0x28f   :  { %v1641_v63 = vadd.f32 %v1637_v45, %v1561_v43 }
 0x291   :  { %v1721_v2 = vadd.f32 %v1717_v54, %v1641_v63 }
 0x293   :  { %v1801_v58 = vadd.f32 %v3930_v35, %v1721_v2  ;;  %v3244_v35 = vld [vmem:[%s4009_s6] ss:$0 sm:$0xff] }
 0x294   :  { %v1719_v27 = vpop.f32.mrf.mxu2 }
 0x296   :  { %v1639_v53 = vpop.f32.mrf.mxu1 }
 0x2ae   :  { %v1877_v62 = vpop.f32.mrf.mxu1 }
 0x2af   :  { %v1881_v7 = vadd.f32 %v1877_v62, %v1801_v58 }
 0x2b1   :  { %v1886_v36 = vadd.f32 %v3243_v6, %v1881_v7 }
 0x2b3   :  { %v1887_v32 = vmax.f32 %v1886_v36, 0.0 }
 0x2b5   :  { %v1888_v8 = vpack.c.bf16 %v1887_v32, %v1887_v32 }
 0x2b6   :  { %v1879_v46 = vpop.f32.mrf.mxu1 }
 0x2b7   :  { %1965 = vmatmul.bf16.vlgmr.msra.gmra.mxu2 %v1888_v8 }
 0x33a   :  { %v1966_v19 = vpop.f32.mrf.mxu2 }
 0x33b   :  { %v1967_v0 = vadd.f32 %v3244_v35, %v1966_v19 }
 0x33d   :  { %v1970_v55 = vmax.f32 %v1967_v0, 0.0 }
 0x33f   :  { %v1971_v10 = vpack.c.bf16 %v1970_v55, %v1970_v55 }
 0x341   :  { %2048 = vmatmul.bf16.vlgmr.msra.gmra.mxu3 %v1971_v10 }
 0x342   :  { %v1968_v26 = vpop.f32.mrf.mxu2 }
 0x3c4   :  { %v2049_v15 = vpop.f32.mrf.mxu3 }
 0x3c5   :  { %v2050_v16 = vadd.f32 %v3245_v47, %v2049_v15 }
 0x3c7   :  { %2053 = vst [vmem:[%s4013_s9] sm:$0xff] %v2050_v16 }
 0x3cc   :  { %v2051_v20 = vpop.f32.mrf.mxu3 }

</bundles_post_ra>
